<compile_context>
chip_gen: v6e
topology: v6e:2x2x1
jax: 0.10.0
libtpu: 0.0.40
codegen_flags: <defaults>
</compile_context>

<pallas_src>
import functools

import jax
import jax.numpy as jnp
from jax.experimental import pallas as pl
from jax.experimental.pallas import tpu as pltpu


def _decoder_fused_kernel(z_ref, w1_ref, b1_ref, w2_ref, b2_ref, w3_ref, b3_ref,
                          o_ref):
    """One batch-tile of the full 3-layer MLP.  All weights VMEM-resident."""
    # Layer 1: (tb, 20) @ (20, 256) + (1, 256) -> ReLU
    h = jnp.dot(z_ref[...], w1_ref[...], preferred_element_type=jnp.float32)
    h = jnp.maximum(h + b1_ref[...], 0.0)
    # Layer 2: (tb, 256) @ (256, 512) + (1, 512) -> ReLU
    h = jnp.dot(h.astype(w2_ref.dtype), w2_ref[...],
                preferred_element_type=jnp.float32)
    h = jnp.maximum(h + b2_ref[...], 0.0)
    # Layer 3: (tb, 512) @ (512, 784) + (1, 784) -> ReLU
    h = jnp.dot(h.astype(w3_ref.dtype), w3_ref[...],
                preferred_element_type=jnp.float32)
    h = jnp.maximum(h + b3_ref[...], 0.0)
    o_ref[...] = h.astype(o_ref.dtype)


@functools.partial(jax.jit, static_argnames=("batch_tile",))
def decoder_forward(params, z, *, batch_tile=512):
    """Fused forward: relu(relu(relu(z@W1+b1)@W2+b2)@W3+b3).

    params: ((w1, b1), (w2, b2), (w3, b3)) with w_i in (in, out) layout and
            b_i shaped (1, out).
    z:      (B, z_dim)
    """
    (w1, b1), (w2, b2), (w3, b3) = params
    B, z_dim = z.shape
    out_dim = w3.shape[1]

    # Pick a batch tile: full batch for small B, else `batch_tile` rows per
    # grid step.  Round the tile up to a sublane multiple (8) and pad the batch
    # so the grid divides evenly; padding rows are sliced off at the end.
    tb = min(batch_tile, B)
    tb = ((tb + 7) // 8) * 8
    pad = (-B) % tb
    if pad:
        z = jnp.pad(z, ((0, pad), (0, 0)))
    Bp = B + pad
    grid = (Bp // tb,)

    flops = 2 * Bp * (w1.shape[0] * w1.shape[1]
                      + w2.shape[0] * w2.shape[1]
                      + w3.shape[0] * w3.shape[1])
    bytes_accessed = sum(int(a.size) * a.dtype.itemsize
                         for a in (z, w1, b1, w2, b2, w3, b3)) \
        + Bp * out_dim * jnp.dtype(z.dtype).itemsize

    out = pl.pallas_call(
        _decoder_fused_kernel,
        out_shape=jax.ShapeDtypeStruct((Bp, out_dim), z.dtype),
        grid_spec=pltpu.PrefetchScalarGridSpec(
            num_scalar_prefetch=0,
            grid=grid,
            in_specs=[
                # Activations: tiled over the batch grid axis.
                pl.BlockSpec((tb, z_dim), lambda i: (i, 0)),
                # Weights / biases: full-array blocks mapped to (0, 0) every
                # step -> DMA'd once, VMEM-resident across the whole grid.
                pl.BlockSpec(w1.shape, lambda i: (0, 0)),
                pl.BlockSpec(b1.shape, lambda i: (0, 0)),
                pl.BlockSpec(w2.shape, lambda i: (0, 0)),
                pl.BlockSpec(b2.shape, lambda i: (0, 0)),
                pl.BlockSpec(w3.shape, lambda i: (0, 0)),
                pl.BlockSpec(b3.shape, lambda i: (0, 0)),
            ],
            out_specs=pl.BlockSpec((tb, out_dim), lambda i: (i, 0)),
        ),
        compiler_params=pltpu.CompilerParams(
            dimension_semantics=("parallel",)),
        cost_estimate=pl.CostEstimate(flops=flops, transcendentals=0,
                                      bytes_accessed=bytes_accessed),
    )(z, w1, b1, w2, b2, w3, b3)

    return out[:B] if pad else out


class Decoder:
    """JAX/Pallas port of the PyTorch Decoder module (fused 3-layer MLP)."""

    def __init__(self, z_dim=20, hiddens_dim=(256, 512), out_dim=784, *,
                 key=jax.random.PRNGKey(0), dtype=jnp.float32):
        dims = [z_dim] + list(hiddens_dim) + [out_dim]
        params = []
        for i in range(len(dims) - 1):
            fan_in, fan_out = dims[i], dims[i + 1]
            key, kw, kb = jax.random.split(key, 3)
            # Deterministic init mimicking nn.Linear's uniform(-1/sqrt(fan_in), ..)
            bound = 1.0 / (fan_in ** 0.5)
            # Stored pre-transposed: (in, out) — no per-call transpose / HBM copy.
            w = jax.random.uniform(kw, (fan_in, fan_out), dtype, -bound, bound)
            b = jax.random.uniform(kb, (1, fan_out), dtype, -bound, bound)
            params.append((w, b))
        self.params = tuple(params)

    def __call__(self, z):
        return decoder_forward(self.params, z)


def _reference_forward(params, z):
    # Plain-JAX reference using the same (in, out) weight layout.
    for (w, b) in params:
        z = jnp.maximum(z @ w + b, 0.0)
    return z


if __name__ == "__main__":
    key = jax.random.PRNGKey(0)
    k_in, k_params = jax.random.split(key)

    batch, z_dim = 8, 20
    z = jax.random.normal(k_in, (batch, z_dim), jnp.float32)

    dec = Decoder(z_dim=z_dim, hiddens_dim=(256, 512), out_dim=784, key=k_params)

    out = dec(z)
    out = jax.block_until_ready(out)

    # Sanity check against a plain-JAX reference.
    ref = _reference_forward(dec.params, z)
    assert out.shape == (batch, 784), out.shape
    assert jnp.allclose(out, ref, atol=1e-4, rtol=1e-4), float(
        jnp.max(jnp.abs(out - ref)))

    print("KERNEL_OK")
</pallas_src>

<mosaic_0001>
module attributes {stable_mosaic.version = 11 : i64} {
  func.func @_decoder_fused_kernel(%arg0: i32, %arg1: memref<8x20xf32, #tpu.memory_space<vmem>>, %arg2: memref<20x256xf32, #tpu.memory_space<vmem>>, %arg3: memref<1x256xf32, #tpu.memory_space<vmem>>, %arg4: memref<256x512xf32, #tpu.memory_space<vmem>>, %arg5: memref<1x512xf32, #tpu.memory_space<vmem>>, %arg6: memref<512x784xf32, #tpu.memory_space<vmem>>, %arg7: memref<1x784xf32, #tpu.memory_space<vmem>>, %arg8: memref<8x784xf32, #tpu.memory_space<vmem>>) attributes {dimension_semantics = [#tpu.dimension_semantics<parallel>], iteration_bounds = array<i64: 1>, scalar_prefetch = 0 : i64, scratch_operands = 0 : i64, tpu.core_type = #tpu.core_type<tc>, window_params = [{transform_indices = @transform_0, window_bounds = array<i64: 8, 20>}, {pipeline_mode = #tpu.pipeline_mode<synchronous>, transform_indices = @transform_1, window_bounds = array<i64: 20, 256>}, {pipeline_mode = #tpu.pipeline_mode<synchronous>, transform_indices = @transform_2, window_bounds = array<i64: 1, 256>}, {pipeline_mode = #tpu.pipeline_mode<synchronous>, transform_indices = @transform_3, window_bounds = array<i64: 256, 512>}, {pipeline_mode = #tpu.pipeline_mode<synchronous>, transform_indices = @transform_4, window_bounds = array<i64: 1, 512>}, {pipeline_mode = #tpu.pipeline_mode<synchronous>, transform_indices = @transform_5, window_bounds = array<i64: 512, 784>}, {pipeline_mode = #tpu.pipeline_mode<synchronous>, transform_indices = @transform_6, window_bounds = array<i64: 1, 784>}, {transform_indices = @transform_7, window_bounds = array<i64: 8, 784>}]} {
    %c0 = arith.constant 0 : index
    %c0_0 = arith.constant 0 : index
    %0 = vector.load %arg1[%c0, %c0_0] : memref<8x20xf32, #tpu.memory_space<vmem>>, vector<8x20xf32>
    %c0_1 = arith.constant 0 : index
    %c0_2 = arith.constant 0 : index
    %1 = vector.load %arg2[%c0_1, %c0_2] : memref<20x256xf32, #tpu.memory_space<vmem>>, vector<20x256xf32>
    %cst = arith.constant dense<0.000000e+00> : vector<8x256xf32>
    %2 = tpu.matmul %0, %1, %cst {dimension_numbers = #tpu.dot_dimension_numbers<[1], [0], [0], [1], [0, 0, 1, 1], [], []>} : vector<8x20xf32>, vector<20x256xf32>, vector<8x256xf32> -> vector<8x256xf32>
    %c0_3 = arith.constant 0 : index
    %c0_4 = arith.constant 0 : index
    %3 = vector.load %arg3[%c0_3, %c0_4] : memref<1x256xf32, #tpu.memory_space<vmem>>, vector<1x256xf32>
    %4 = vector.broadcast %3 : vector<1x256xf32> to vector<8x256xf32>
    %5 = arith.addf %2, %4 : vector<8x256xf32>
    %cst_5 = arith.constant 0.000000e+00 : f32
    %6 = vector.broadcast %cst_5 : f32 to vector<8x256xf32>
    %7 = arith.maximumf %5, %6 : vector<8x256xf32>
    %c0_6 = arith.constant 0 : index
    %c0_7 = arith.constant 0 : index
    %8 = vector.load %arg4[%c0_6, %c0_7] : memref<256x512xf32, #tpu.memory_space<vmem>>, vector<256x512xf32>
    %cst_8 = arith.constant dense<0.000000e+00> : vector<8x512xf32>
    %9 = tpu.matmul %7, %8, %cst_8 {dimension_numbers = #tpu.dot_dimension_numbers<[1], [0], [0], [1], [0, 0, 1, 1], [], []>} : vector<8x256xf32>, vector<256x512xf32>, vector<8x512xf32> -> vector<8x512xf32>
    %c0_9 = arith.constant 0 : index
    %c0_10 = arith.constant 0 : index
    %10 = vector.load %arg5[%c0_9, %c0_10] : memref<1x512xf32, #tpu.memory_space<vmem>>, vector<1x512xf32>
    %11 = vector.broadcast %10 : vector<1x512xf32> to vector<8x512xf32>
    %12 = arith.addf %9, %11 : vector<8x512xf32>
    %cst_11 = arith.constant 0.000000e+00 : f32
    %13 = vector.broadcast %cst_11 : f32 to vector<8x512xf32>
    %14 = arith.maximumf %12, %13 : vector<8x512xf32>
    %c0_12 = arith.constant 0 : index
    %c0_13 = arith.constant 0 : index
    %15 = vector.load %arg6[%c0_12, %c0_13] : memref<512x784xf32, #tpu.memory_space<vmem>>, vector<512x784xf32>
    %cst_14 = arith.constant dense<0.000000e+00> : vector<8x784xf32>
    %16 = tpu.matmul %14, %15, %cst_14 {dimension_numbers = #tpu.dot_dimension_numbers<[1], [0], [0], [1], [0, 0, 1, 1], [], []>} : vector<8x512xf32>, vector<512x784xf32>, vector<8x784xf32> -> vector<8x784xf32>
    %c0_15 = arith.constant 0 : index
    %c0_16 = arith.constant 0 : index
    %17 = vector.load %arg7[%c0_15, %c0_16] : memref<1x784xf32, #tpu.memory_space<vmem>>, vector<1x784xf32>
    %18 = vector.broadcast %17 : vector<1x784xf32> to vector<8x784xf32>
    %19 = arith.addf %16, %18 : vector<8x784xf32>
    %cst_17 = arith.constant 0.000000e+00 : f32
    %20 = vector.broadcast %cst_17 : f32 to vector<8x784xf32>
    %21 = arith.maximumf %19, %20 : vector<8x784xf32>
    %c0_18 = arith.constant 0 : index
    %c0_19 = arith.constant 0 : index
    %22 = vector.load %arg8[%c0_18, %c0_19] : memref<8x784xf32, #tpu.memory_space<vmem>>, vector<8x784xf32>
    tpu.vector_store %arg8[%c0_18, %c0_19], %21 {strides = array<i32>} : memref<8x784xf32, #tpu.memory_space<vmem>>, vector<8x784xf32>,
    return
  }
  func.func @transform_0(%arg0: i32) -> (i32, i32) {
    %c0_i32 = arith.constant 0 : i32
    %c0_i32_0 = arith.constant 0 : i32
    return %arg0, %c0_i32 : i32, i32
  }
  func.func @transform_1(%arg0: i32) -> (i32, i32) {
    %c0_i32 = arith.constant 0 : i32
    %c0_i32_0 = arith.constant 0 : i32
    %c0_i32_1 = arith.constant 0 : i32
    return %c0_i32, %c0_i32_0 : i32, i32
  }
  func.func @transform_2(%arg0: i32) -> (i32, i32) {
    %c0_i32 = arith.constant 0 : i32
    %c0_i32_0 = arith.constant 0 : i32
    %c0_i32_1 = arith.constant 0 : i32
    return %c0_i32, %c0_i32_0 : i32, i32
  }
  func.func @transform_3(%arg0: i32) -> (i32, i32) {
    %c0_i32 = arith.constant 0 : i32
    %c0_i32_0 = arith.constant 0 : i32
    %c0_i32_1 = arith.constant 0 : i32
    return %c0_i32, %c0_i32_0 : i32, i32
  }
  func.func @transform_4(%arg0: i32) -> (i32, i32) {
    %c0_i32 = arith.constant 0 : i32
    %c0_i32_0 = arith.constant 0 : i32
    %c0_i32_1 = arith.constant 0 : i32
    return %c0_i32, %c0_i32_0 : i32, i32
  }
  func.func @transform_5(%arg0: i32) -> (i32, i32) {
    %c0_i32 = arith.constant 0 : i32
    %c0_i32_0 = arith.constant 0 : i32
    %c0_i32_1 = arith.constant 0 : i32
    return %c0_i32, %c0_i32_0 : i32, i32
  }
  func.func @transform_6(%arg0: i32) -> (i32, i32) {
    %c0_i32 = arith.constant 0 : i32
    %c0_i32_0 = arith.constant 0 : i32
    %c0_i32_1 = arith.constant 0 : i32
    return %c0_i32, %c0_i32_0 : i32, i32
  }
  func.func @transform_7(%arg0: i32) -> (i32, i32) {
    %c0_i32 = arith.constant 0 : i32
    %c0_i32_0 = arith.constant 0 : i32
    return %arg0, %c0_i32 : i32, i32
  }
}

</mosaic_0001>

<bundles_post_ra>
// kernel: decoder_forward.1
= control target key start
LH: loop header
LB: loop body
LE: loop exit
PB: predicated region body
PF: predicated region fallthrough
CT: control target
= control target key end

     0   :  { %vm50_vm0 = vcmask 1043456   ;;  %v1603_v5 = vmov 0.0   ;;  %vm46_vm1 = vcmask 162816   ;;  %s3457_s0 = inlined_call_operand.vmem [shape: f32[8,20], index: 0, kind: input, shape index: {}]   ;;  %s3458_s1 = inlined_call_operand.vmem [shape: f32[20,256], index: 1, kind: input, shape index: {}]   ;;  %s3459_s2 = inlined_call_operand.vmem [shape: f32[1,256], index: 2, kind: input, shape index: {}]   ;;  %s3460_s3 = inlined_call_operand.vmem [shape: f32[256,512], index: 3, kind: input, shape index: {}]   ;;  %s3461_s4 = inlined_call_operand.vmem [shape: f32[1,512], index: 4, kind: input, shape index: {}]   ;;  %s3462_s5 = inlined_call_operand.vmem [shape: f32[512,784], index: 5, kind: input, shape index: {}]   ;;  %s3463_s6 = inlined_call_operand.vmem [shape: f32[1,784], index: 6, kind: input, shape index: {}]   ;;  %s3464_s7 = inlined_call_operand.hbm [shape: f32[8,784], index: 7, kind: output, shape index: {}]  }
   0x1   :  { %v33_v0 = vld [vmem:[%s3458_s1 + $0x28] sm:$0xf]  ;;  %v32_v1 = vld [vmem:[%s3458_s1 + $0x20] sm:$0xf]  ;;  %v31_v2 = vld [vmem:[%s3458_s1 + $0x18] sm:$0xff]  ;;  %121 = vmatprep.mubr.f32.mxu0 %v1603_v5 }
   0x2   :  { %1506 = vmatprep.subr.msk.mxu0 %vm50_vm0, %v33_v0  ;;  %v30_v3 = vld [vmem:[%s3458_s1 + $0x10] sm:$0xff]  ;;  %v29_v4 = vld [vmem:[%s3458_s1 + $0x8] sm:$0xff]  ;;  %v28_v7 = vld [vmem:[%s3458_s1] sm:$0xff] }
   0x3   :  { %1507 = vmatpush1.msk.msra.mxu0 %vm50_vm0, %v32_v1  ;;  %v191_v6 = vld [vmem:[%s3460_s3 + $0x1e8] sm:$0xff]  ;;  %v190_v8 = vld [vmem:[%s3460_s3 + $0x1e0] sm:$0xff]  ;;  %v193_v11 = vld [vmem:[%s3460_s3 + $0x1f8] sm:$0xff] }
   0x4   :  { %85 = vmatprep.subr.mxu0 %v31_v2  ;;  %280 = vmatprep.subr.mxu1 %v191_v6  ;;  %v187_v9 = vld [vmem:[%s3460_s3 + $0x1c8] sm:$0xff]  ;;  %v27_v10 = vld [vmem:[%s3457_s0] sm:$0xff]  ;;  %v192_v13 = vld [vmem:[%s3460_s3 + $0x1f0] sm:$0xff] }
   0x5   :  { %86 = vmatpush1.msra.mxu0 %v30_v3  ;;  %281 = vmatpush1.msra.mxu1 %v190_v8  ;;  %v186_v12 = vld [vmem:[%s3460_s3 + $0x1c0] sm:$0xff]  ;;  %v183_v14 = vld [vmem:[%s3460_s3 + $0x1a8] sm:$0xff]  ;;  %v189_v15 = vld [vmem:[%s3460_s3 + $0x1d8] sm:$0xff] }
   0x6   :  { %87 = vmatprep.subr.mxu0 %v29_v4  ;;  %282 = vmatprep.subr.mxu1 %v187_v9  ;;  %v182_v16 = vld [vmem:[%s3460_s3 + $0x1a0] sm:$0xff]  ;;  %v188_v17 = vld [vmem:[%s3460_s3 + $0x1d0] sm:$0xff]  ;;  %v179_v18 = vld [vmem:[%s3460_s3 + $0x188] sm:$0xff] }
   0x7   :  { %88 = vmatpush1.msra.mxu0 %v28_v7  ;;  %283 = vmatpush1.msra.mxu1 %v186_v12  ;;  %v185_v19 = vld [vmem:[%s3460_s3 + $0x1b8] sm:$0xff]  ;;  %v178_v20 = vld [vmem:[%s3460_s3 + $0x180] sm:$0xff]  ;;  %v184_v21 = vld [vmem:[%s3460_s3 + $0x1b0] sm:$0xff] }
   0x8   :  { %1508 = vmatmul.mubr.msk.f32.vlgmr.msra.gmra.mxu0 %vm46_vm1, %v27_v10  ;;  %351 = vmatprep.subr.mxu0 %v193_v11  ;;  %v175_v22 = vld [vmem:[%s3460_s3 + $0x168] sm:$0xff]  ;;  %v181_v23 = vld [vmem:[%s3460_s3 + $0x198] sm:$0xff]  ;;  %v174_v24 = vld [vmem:[%s3460_s3 + $0x160] sm:$0xff] }
   0x9   :  { %352 = vmatpush1.msra.mxu0 %v192_v13  ;;  %284 = vmatprep.subr.mxu1 %v183_v14  ;;  %v180_v25 = vld [vmem:[%s3460_s3 + $0x190] sm:$0xff]  ;;  %v171_v26 = vld [vmem:[%s3460_s3 + $0x148] sm:$0xff]  ;;  %v177_v27 = vld [vmem:[%s3460_s3 + $0x178] sm:$0xff] }
   0xa   :  { %353 = vmatprep.subr.mxu0 %v189_v15  ;;  %285 = vmatpush1.msra.mxu1 %v182_v16  ;;  %v170_v28 = vld [vmem:[%s3460_s3 + $0x140] sm:$0xff]  ;;  %v176_v29 = vld [vmem:[%s3460_s3 + $0x170] sm:$0xff]  ;;  %v167_v30 = vld [vmem:[%s3460_s3 + $0x128] sm:$0xff] }
   0xb   :  { %354 = vmatpush1.msra.mxu0 %v188_v17  ;;  %286 = vmatprep.subr.mxu1 %v179_v18  ;;  %v173_v31 = vld [vmem:[%s3460_s3 + $0x158] sm:$0xff]  ;;  %v166_v32 = vld [vmem:[%s3460_s3 + $0x120] sm:$0xff]  ;;  %v172_v33 = vld [vmem:[%s3460_s3 + $0x150] sm:$0xff] }
   0xc   :  { %355 = vmatprep.subr.mxu0 %v185_v19  ;;  %287 = vmatpush1.msra.mxu1 %v178_v20  ;;  %v163_v34 = vld [vmem:[%s3460_s3 + $0x108] sm:$0xff]  ;;  %v169_v35 = vld [vmem:[%s3460_s3 + $0x138] sm:$0xff]  ;;  %v162_v36 = vld [vmem:[%s3460_s3 + $0x100] sm:$0xff] }
   0xd   :  { %356 = vmatpush1.msra.mxu0 %v184_v21  ;;  %288 = vmatprep.subr.mxu1 %v175_v22  ;;  %v168_v37 = vld [vmem:[%s3460_s3 + $0x130] sm:$0xff]  ;;  %v159_v38 = vld [vmem:[%s3460_s3 + $0xe8] sm:$0xff]  ;;  %v165_v39 = vld [vmem:[%s3460_s3 + $0x118] sm:$0xff] }
   0xe   :  { %357 = vmatprep.subr.mxu0 %v181_v23  ;;  %289 = vmatpush1.msra.mxu1 %v174_v24  ;;  %v158_v40 = vld [vmem:[%s3460_s3 + $0xe0] sm:$0xff]  ;;  %v164_v41 = vld [vmem:[%s3460_s3 + $0x110] sm:$0xff]  ;;  %v155_v42 = vld [vmem:[%s3460_s3 + $0xc8] sm:$0xff] }
   0xf   :  { %358 = vmatpush1.msra.mxu0 %v180_v25  ;;  %290 = vmatprep.subr.mxu1 %v171_v26  ;;  %v161_v43 = vld [vmem:[%s3460_s3 + $0xf8] sm:$0xff]  ;;  %v154_v44 = vld [vmem:[%s3460_s3 + $0xc0] sm:$0xff]  ;;  %v160_v45 = vld [vmem:[%s3460_s3 + $0xf0] sm:$0xff] }
  0x10   :  { %359 = vmatprep.subr.mxu0 %v177_v27  ;;  %291 = vmatpush1.msra.mxu1 %v170_v28  ;;  %v151_v46 = vld [vmem:[%s3460_s3 + $0xa8] sm:$0xff]  ;;  %v157_v47 = vld [vmem:[%s3460_s3 + $0xd8] sm:$0xff]  ;;  %v150_v48 = vld [vmem:[%s3460_s3 + $0xa0] sm:$0xff] }
  0x11   :  { %360 = vmatpush1.msra.mxu0 %v176_v29  ;;  %292 = vmatprep.subr.mxu1 %v167_v30  ;;  %v156_v49 = vld [vmem:[%s3460_s3 + $0xd0] sm:$0xff]  ;;  %v147_v50 = vld [vmem:[%s3460_s3 + $0x88] sm:$0xff]  ;;  %v153_v51 = vld [vmem:[%s3460_s3 + $0xb8] sm:$0xff] }
  0x12   :  { %361 = vmatprep.subr.mxu0 %v173_v31  ;;  %293 = vmatpush1.msra.mxu1 %v166_v32  ;;  %v146_v52 = vld [vmem:[%s3460_s3 + $0x80] sm:$0xff]  ;;  %v152_v53 = vld [vmem:[%s3460_s3 + $0xb0] sm:$0xff]  ;;  %v143_v54 = vld [vmem:[%s3460_s3 + $0x68] sm:$0xff] }
  0x13   :  { %362 = vmatpush1.msra.mxu0 %v172_v33  ;;  %294 = vmatprep.subr.mxu1 %v163_v34  ;;  %v149_v55 = vld [vmem:[%s3460_s3 + $0x98] sm:$0xff]  ;;  %v142_v56 = vld [vmem:[%s3460_s3 + $0x60] sm:$0xff]  ;;  %v148_v57 = vld [vmem:[%s3460_s3 + $0x90] sm:$0xff] }
  0x14   :  { %363 = vmatprep.subr.mxu0 %v169_v35  ;;  %295 = vmatpush1.msra.mxu1 %v162_v36  ;;  %v139_v58 = vld [vmem:[%s3460_s3 + $0x48] sm:$0xff]  ;;  %v145_v59 = vld [vmem:[%s3460_s3 + $0x78] sm:$0xff]  ;;  %v138_v60 = vld [vmem:[%s3460_s3 + $0x40] sm:$0xff] }
  0x15   :  { %364 = vmatpush1.msra.mxu0 %v168_v37  ;;  %296 = vmatprep.subr.mxu1 %v159_v38  ;;  %v144_v61 = vld [vmem:[%s3460_s3 + $0x70] sm:$0xff]  ;;  %v135_v62 = vld [vmem:[%s3460_s3 + $0x28] sm:$0xff]  ;;  %v141_v63 = vld [vmem:[%s3460_s3 + $0x58] sm:$0xff] }
  0x16   :  { %365 = vmatprep.subr.mxu0 %v165_v39  ;;  %297 = vmatpush1.msra.mxu1 %v158_v40  ;;  %v134_v0 = vld [vmem:[%s3460_s3 + $0x20] sm:$0xff]  ;;  %v140_v1 = vld [vmem:[%s3460_s3 + $0x50] sm:$0xff]  ;;  %v131_v2 = vld [vmem:[%s3460_s3 + $0x8] sm:$0xff] }
  0x17   :  { %366 = vmatpush1.msra.mxu0 %v164_v41  ;;  %298 = vmatprep.subr.mxu1 %v155_v42  ;;  %v137_v3 = vld [vmem:[%s3460_s3 + $0x38] sm:$0xff]  ;;  %v130_v4 = vld [vmem:[%s3460_s3] sm:$0xff]  ;;  %v136_v5 = vld [vmem:[%s3460_s3 + $0x30] sm:$0xff] }
  0x18   :  { %367 = vmatprep.subr.mxu0 %v161_v43  ;;  %299 = vmatpush1.msra.mxu1 %v154_v44  ;;  %v255_v6 = vld [vmem:[%s3460_s3 + $0x3e8] sm:$0xff]  ;;  %v133_v7 = vld [vmem:[%s3460_s3 + $0x18] sm:$0xff]  ;;  %v254_v8 = vld [vmem:[%s3460_s3 + $0x3e0] sm:$0xff] }
  0x19   :  { %368 = vmatpush1.msra.mxu0 %v160_v45  ;;  %300 = vmatprep.subr.mxu1 %v151_v46  ;;  %v132_v9 = vld [vmem:[%s3460_s3 + $0x10] sm:$0xff]  ;;  %v251_v10 = vld [vmem:[%s3460_s3 + $0x3c8] sm:$0xff]  ;;  %v257_v11 = vld [vmem:[%s3460_s3 + $0x3f8] sm:$0xff] }
  0x1a   :  { %369 = vmatprep.subr.mxu0 %v157_v47  ;;  %301 = vmatpush1.msra.mxu1 %v150_v48  ;;  %v250_v12 = vld [vmem:[%s3460_s3 + $0x3c0] sm:$0xff]  ;;  %v256_v13 = vld [vmem:[%s3460_s3 + $0x3f0] sm:$0xff]  ;;  %v247_v14 = vld [vmem:[%s3460_s3 + $0x3a8] sm:$0xff] }
  0x1b   :  { %370 = vmatpush1.msra.mxu0 %v156_v49  ;;  %302 = vmatprep.subr.mxu1 %v147_v50  ;;  %v253_v15 = vld [vmem:[%s3460_s3 + $0x3d8] sm:$0xff]  ;;  %v246_v16 = vld [vmem:[%s3460_s3 + $0x3a0] sm:$0xff]  ;;  %v252_v17 = vld [vmem:[%s3460_s3 + $0x3d0] sm:$0xff] }
  0x1c   :  { %371 = vmatprep.subr.mxu0 %v153_v51  ;;  %303 = vmatpush1.msra.mxu1 %v146_v52  ;;  %v243_v18 = vld [vmem:[%s3460_s3 + $0x388] sm:$0xff]  ;;  %v249_v19 = vld [vmem:[%s3460_s3 + $0x3b8] sm:$0xff]  ;;  %v242_v20 = vld [vmem:[%s3460_s3 + $0x380] sm:$0xff] }
  0x1d   :  { %372 = vmatpush1.msra.mxu0 %v152_v53  ;;  %304 = vmatprep.subr.mxu1 %v143_v54 }
  0x1e   :  { %373 = vmatprep.subr.mxu0 %v149_v55  ;;  %305 = vmatpush1.msra.mxu1 %v142_v56 }
  0x1f   :  { %374 = vmatpush1.msra.mxu0 %v148_v57  ;;  %306 = vmatprep.subr.mxu1 %v139_v58 }
  0x20   :  { %375 = vmatprep.subr.mxu0 %v145_v59  ;;  %307 = vmatpush1.msra.mxu1 %v138_v60 }
  0x21   :  { %376 = vmatpush1.msra.mxu0 %v144_v61  ;;  %308 = vmatprep.subr.mxu1 %v135_v62 }
  0x22   :  { %377 = vmatprep.subr.mxu0 %v141_v63  ;;  %309 = vmatpush1.msra.mxu1 %v134_v0 }
  0x23   :  { %378 = vmatpush1.msra.mxu0 %v140_v1  ;;  %310 = vmatprep.subr.mxu1 %v131_v2 }
  0x24   :  { %379 = vmatprep.subr.mxu0 %v137_v3  ;;  %311 = vmatpush1.msra.mxu1 %v130_v4 }
  0x25   :  { %380 = vmatpush1.msra.mxu0 %v136_v5  ;;  %312 = vmatprep.subr.mxu1 %v255_v6 }
  0x26   :  { %381 = vmatprep.subr.mxu0 %v133_v7  ;;  %313 = vmatpush2.msra.mxu1 %v254_v8 }
  0x27   :  { %382 = vmatpush1.msra.mxu0 %v132_v9  ;;  %314 = vmatprep.subr.mxu1 %v251_v10 }
  0x28   :  { %383 = vmatprep.subr.mxu0 %v257_v11  ;;  %315 = vmatpush2.msra.mxu1 %v250_v12 }
  0x29   :  { %384 = vmatpush2.msra.mxu0 %v256_v13  ;;  %316 = vmatprep.subr.mxu1 %v247_v14 }
  0x2a   :  { %12 = vsyncpa [#allocation3], 0  ;;  %385 = vmatprep.subr.mxu0 %v253_v15  ;;  %317 = vmatpush2.msra.mxu1 %v246_v16  ;;  %v248_v21 = vld [vmem:[%s3460_s3 + $0x3b0] sm:$0xff]  ;;  %v239_v22 = vld [vmem:[%s3460_s3 + $0x368] sm:$0xff]  ;;  %v36_v10 = vlaneseq  ;;  %vm1490_vm2 = vcmask 130048  }
  0x2b   :  { %386 = vmatpush2.msra.mxu0 %v252_v17  ;;  %318 = vmatprep.subr.mxu1 %v243_v18  ;;  %v245_v23 = vld [vmem:[%s3460_s3 + $0x398] sm:$0xff]  ;;  %v238_v24 = vld [vmem:[%s3460_s3 + $0x360] sm:$0xff]  ;;  %v244_v25 = vld [vmem:[%s3460_s3 + $0x390] sm:$0xff] }
  0x2c   :  { %387 = vmatprep.subr.mxu0 %v249_v19  ;;  %319 = vmatpush2.msra.mxu1 %v242_v20  ;;  %v235_v26 = vld [vmem:[%s3460_s3 + $0x348] sm:$0xff]  ;;  %v241_v27 = vld [vmem:[%s3460_s3 + $0x378] sm:$0xff]  ;;  %v234_v28 = vld [vmem:[%s3460_s3 + $0x340] sm:$0xff]  ;;  %v2056_v11 = vshrl.u32 %v36_v10, 7 }
  0x2d   :  { %388 = vmatpush2.msra.mxu0 %v248_v21  ;;  %320 = vmatprep.subr.mxu1 %v239_v22  ;;  %v240_v29 = vld [vmem:[%s3460_s3 + $0x370] sm:$0xff]  ;;  %v231_v30 = vld [vmem:[%s3460_s3 + $0x328] sm:$0xff]  ;;  %v237_v31 = vld [vmem:[%s3460_s3 + $0x358] sm:$0xff] }
  0x2e   :  { %389 = vmatprep.subr.mxu0 %v245_v23  ;;  %321 = vmatpush2.msra.mxu1 %v238_v24  ;;  %v230_v32 = vld [vmem:[%s3460_s3 + $0x320] sm:$0xff]  ;;  %v236_v33 = vld [vmem:[%s3460_s3 + $0x350] sm:$0xff]  ;;  %v227_v34 = vld [vmem:[%s3460_s3 + $0x308] sm:$0xff]  ;;  %v2059_v12 = vsub.s32 0, %v2056_v11  ;;  %v2065_v14 = vsub.s32 1, %v2056_v11 }
  0x2f   :  { %390 = vmatpush2.msra.mxu0 %v244_v25  ;;  %322 = vmatprep.subr.mxu1 %v235_v26  ;;  %v233_v35 = vld [vmem:[%s3460_s3 + $0x338] sm:$0xff]  ;;  %v226_v36 = vld [vmem:[%s3460_s3 + $0x300] sm:$0xff]  ;;  %v232_v37 = vld [vmem:[%s3460_s3 + $0x330] sm:$0xff] }
  0x30   :  { %391 = vmatprep.subr.mxu0 %v241_v27  ;;  %323 = vmatpush2.msra.mxu1 %v234_v28  ;;  %v223_v38 = vld [vmem:[%s3460_s3 + $0x2e8] sm:$0xff]  ;;  %v229_v39 = vld [vmem:[%s3460_s3 + $0x318] sm:$0xff]  ;;  %v222_v40 = vld [vmem:[%s3460_s3 + $0x2e0] sm:$0xff] }
  0x31   :  { %392 = vmatpush2.msra.mxu0 %v240_v29  ;;  %324 = vmatprep.subr.mxu1 %v231_v30  ;;  %v228_v41 = vld [vmem:[%s3460_s3 + $0x310] sm:$0xff]  ;;  %v219_v42 = vld [vmem:[%s3460_s3 + $0x2c8] sm:$0xff]  ;;  %v225_v43 = vld [vmem:[%s3460_s3 + $0x2f8] sm:$0xff] }
  0x32   :  { %393 = vmatprep.subr.mxu0 %v237_v31  ;;  %325 = vmatpush2.msra.mxu1 %v230_v32  ;;  %v218_v44 = vld [vmem:[%s3460_s3 + $0x2c0] sm:$0xff]  ;;  %v224_v45 = vld [vmem:[%s3460_s3 + $0x2f0] sm:$0xff]  ;;  %v215_v46 = vld [vmem:[%s3460_s3 + $0x2a8] sm:$0xff] }
  0x33   :  { %394 = vmatpush2.msra.mxu0 %v236_v33  ;;  %326 = vmatprep.subr.mxu1 %v227_v34  ;;  %v221_v47 = vld [vmem:[%s3460_s3 + $0x2d8] sm:$0xff]  ;;  %v214_v48 = vld [vmem:[%s3460_s3 + $0x2a0] sm:$0xff]  ;;  %v220_v49 = vld [vmem:[%s3460_s3 + $0x2d0] sm:$0xff] }
  0x34   :  { %395 = vmatprep.subr.mxu0 %v233_v35  ;;  %327 = vmatpush2.msra.mxu1 %v226_v36  ;;  %v211_v50 = vld [vmem:[%s3460_s3 + $0x288] sm:$0xff]  ;;  %v217_v51 = vld [vmem:[%s3460_s3 + $0x2b8] sm:$0xff]  ;;  %v210_v52 = vld [vmem:[%s3460_s3 + $0x280] sm:$0xff] }
  0x35   :  { %396 = vmatpush2.msra.mxu0 %v232_v37  ;;  %328 = vmatprep.subr.mxu1 %v223_v38  ;;  %v216_v53 = vld [vmem:[%s3460_s3 + $0x2b0] sm:$0xff]  ;;  %v213_v54 = vld [vmem:[%s3460_s3 + $0x298] sm:$0xff]  ;;  %v207_v56 = vld [vmem:[%s3460_s3 + $0x268] sm:$0xff] }
  0x36   :  { %397 = vmatprep.subr.mxu0 %v229_v39  ;;  %329 = vmatpush2.msra.mxu1 %v222_v40  ;;  %v212_v55 = vld [vmem:[%s3460_s3 + $0x290] sm:$0xff]  ;;  %v209_v57 = vld [vmem:[%s3460_s3 + $0x278] sm:$0xff]  ;;  %v206_v58 = vld [vmem:[%s3460_s3 + $0x260] sm:$0xff] }
  0x37   :  { %398 = vmatpush2.msra.mxu0 %v228_v41  ;;  %330 = vmatprep.subr.mxu1 %v219_v42  ;;  %v208_v59 = vld [vmem:[%s3460_s3 + $0x270] sm:$0xff]  ;;  %v203_v60 = vld [vmem:[%s3460_s3 + $0x248] sm:$0xff]  ;;  %v205_v61 = vld [vmem:[%s3460_s3 + $0x258] sm:$0xff] }
  0x38   :  { %399 = vmatprep.subr.mxu0 %v225_v43  ;;  %331 = vmatpush2.msra.mxu1 %v218_v44  ;;  %v202_v62 = vld [vmem:[%s3460_s3 + $0x240] sm:$0xff]  ;;  %v204_v63 = vld [vmem:[%s3460_s3 + $0x250] sm:$0xff]  ;;  %v199_v0 = vld [vmem:[%s3460_s3 + $0x228] sm:$0xff] }
  0x39   :  { %400 = vmatpush2.msra.mxu0 %v224_v45  ;;  %332 = vmatprep.subr.mxu1 %v215_v46  ;;  %v201_v1 = vld [vmem:[%s3460_s3 + $0x238] sm:$0xff]  ;;  %v198_v2 = vld [vmem:[%s3460_s3 + $0x220] sm:$0xff]  ;;  %v200_v3 = vld [vmem:[%s3460_s3 + $0x230] sm:$0xff] }
  0x3a   :  { %401 = vmatprep.subr.mxu0 %v221_v47  ;;  %333 = vmatpush2.msra.mxu1 %v214_v48  ;;  %v195_v4 = vld [vmem:[%s3460_s3 + $0x208] sm:$0xff]  ;;  %v197_v5 = vld [vmem:[%s3460_s3 + $0x218] sm:$0xff]  ;;  %v194_v6 = vld [vmem:[%s3460_s3 + $0x200] sm:$0xff] }
  0x3b   :  { %402 = vmatpush2.msra.mxu0 %v220_v49  ;;  %334 = vmatprep.subr.mxu1 %v211_v50  ;;  %v196_v7 = vld [vmem:[%s3460_s3 + $0x210] sm:$0xff]  ;;  %v34_v13 = vld [vmem:[%s3459_s2] sm:$0x3]  ;;  %v531_v23 = vld [vmem:[%s3462_s5 + $0x348] sm:$0xff] }
  0x3c   :  { %403 = vmatprep.subr.mxu0 %v217_v51  ;;  %335 = vmatpush2.msra.mxu1 %v210_v52  ;;  %v532_v8 = vld [vmem:[%s3462_s5 + $0x350] sm:$0xff]  ;;  %v39_v15 = vrot.slane %v34_v13, %v2059_v12  ;;  %v43_v16 = vrot.slane %v34_v13, %v2065_v14  ;;  %v755_v24 = vld [vmem:[%s3462_s5 + $0xa48] sm:$0xff]  ;;  %v525_v25 = vld [vmem:[%s3462_s5 + $0x318] sm:$0xff] }
  0x3d   :  { %404 = vmatpush2.msra.mxu0 %v216_v53  ;;  %336 = vmatprep.subr.mxu1 %v207_v56  ;;  %v756_v9 = vld [vmem:[%s3462_s5 + $0xa50] sm:$0xff]  ;;  %v749_v26 = vld [vmem:[%s3462_s5 + $0xa18] sm:$0xff]  ;;  %v518_v29 = vld [vmem:[%s3462_s5 + $0x2e0] sm:$0xff] }
  0x3e   :  { %405 = vmatprep.subr.mxu0 %v213_v54  ;;  %337 = vmatpush2.msra.mxu1 %v206_v58  ;;  %v524_v27 = vld [vmem:[%s3462_s5 + $0x310] sm:$0xff]  ;;  %v742_v30 = vld [vmem:[%s3462_s5 + $0x9e0] sm:$0xff]  ;;  %v517_v31 = vld [vmem:[%s3462_s5 + $0x2d8] sm:$0xff] }
  0x3f   :  { %406 = vmatpush2.msra.mxu0 %v212_v55  ;;  %338 = vmatprep.subr.mxu1 %v203_v60  ;;  %v748_v28 = vld [vmem:[%s3462_s5 + $0xa10] sm:$0xff]  ;;  %v741_v32 = vld [vmem:[%s3462_s5 + $0x9d8] sm:$0xff]  ;;  %v511_v33 = vld [vmem:[%s3462_s5 + $0x2a8] sm:$0xff] }
  0x40   :  { %407 = vmatprep.subr.mxu0 %v209_v57  ;;  %339 = vmatpush2.msra.mxu1 %v202_v62  ;;  %v735_v34 = vld [vmem:[%s3462_s5 + $0x9a8] sm:$0xff]  ;;  %v510_v35 = vld [vmem:[%s3462_s5 + $0x2a0] sm:$0xff]  ;;  %v504_v37 = vld [vmem:[%s3462_s5 + $0x270] sm:$0xff] }
  0x41   :  { %408 = vmatpush2.msra.mxu0 %v208_v59  ;;  %340 = vmatprep.subr.mxu1 %v199_v0  ;;  %v734_v36 = vld [vmem:[%s3462_s5 + $0x9a0] sm:$0xff]  ;;  %v728_v38 = vld [vmem:[%s3462_s5 + $0x970] sm:$0xff]  ;;  %v503_v39 = vld [vmem:[%s3462_s5 + $0x268] sm:$0xff] }
  0x42   :  { %409 = vmatprep.subr.mxu0 %v205_v61  ;;  %341 = vmatpush2.msra.mxu1 %v198_v2  ;;  %v727_v40 = vld [vmem:[%s3462_s5 + $0x968] sm:$0xff]  ;;  %v497_v41 = vld [vmem:[%s3462_s5 + $0x238] sm:$0xff]  ;;  %v496_v43 = vld [vmem:[%s3462_s5 + $0x230] sm:$0xff] }
  0x43   :  { %410 = vmatpush2.msra.mxu0 %v204_v63  ;;  %342 = vmatprep.subr.mxu1 %v195_v4  ;;  %v721_v42 = vld [vmem:[%s3462_s5 + $0x938] sm:$0xff]  ;;  %v720_v44 = vld [vmem:[%s3462_s5 + $0x930] sm:$0xff]  ;;  %v490_v45 = vld [vmem:[%s3462_s5 + $0x200] sm:$0xff] }
  0x44   :  { %411 = vmatprep.subr.mxu0 %v201_v1  ;;  %343 = vmatpush2.msra.mxu1 %v194_v6  ;;  %v714_v46 = vld [vmem:[%s3462_s5 + $0x900] sm:$0xff]  ;;  %v489_v47 = vld [vmem:[%s3462_s5 + $0x1f8] sm:$0xff]  ;;  %v483_v49 = vld [vmem:[%s3462_s5 + $0x1c8] sm:$0xff] }
  0x45   :  { %412 = vmatpush2.msra.mxu0 %v200_v3  ;;  %911 = vmatprep.subr.mxu1 %v532_v8  ;;  %v713_v48 = vld [vmem:[%s3462_s5 + $0x8f8] sm:$0xff]  ;;  %v707_v50 = vld [vmem:[%s3462_s5 + $0x8c8] sm:$0xff]  ;;  %v482_v51 = vld [vmem:[%s3462_s5 + $0x1c0] sm:$0xff] }
  0x46   :  { %413 = vmatprep.subr.mxu0 %v197_v5  ;;  %v706_v52 = vld [vmem:[%s3462_s5 + $0x8c0] sm:$0xff]  ;;  %v476_v53 = vld [vmem:[%s3462_s5 + $0x190] sm:$0xff]  ;;  %v475_v55 = vld [vmem:[%s3462_s5 + $0x188] sm:$0xff] }
  0x47   :  { %414 = vmatpush2.msra.mxu0 %v196_v7  ;;  %v700_v54 = vld [vmem:[%s3462_s5 + $0x890] sm:$0xff]  ;;  %v699_v56 = vld [vmem:[%s3462_s5 + $0x888] sm:$0xff]  ;;  %v469_v57 = vld [vmem:[%s3462_s5 + $0x158] sm:$0xff] }
  0x48   :  { %982 = vmatprep.subr.mxu0 %v756_v9  ;;  %v693_v58 = vld [vmem:[%s3462_s5 + $0x858] sm:$0xff]  ;;  %v468_v59 = vld [vmem:[%s3462_s5 + $0x150] sm:$0xff]  ;;  %v462_v61 = vld [vmem:[%s3462_s5 + $0x120] sm:$0xff] }
  0x49   :  { %v692_v60 = vld [vmem:[%s3462_s5 + $0x850] sm:$0xff]  ;;  %v686_v62 = vld [vmem:[%s3462_s5 + $0x820] sm:$0xff]  ;;  %v461_v63 = vld [vmem:[%s3462_s5 + $0x118] sm:$0xff] }
  0x4a   :  { %v685_v0 = vld [vmem:[%s3462_s5 + $0x818] sm:$0xff]  ;;  %v455_v1 = vld [vmem:[%s3462_s5 + $0xe8] sm:$0xff]  ;;  %v454_v3 = vld [vmem:[%s3462_s5 + $0xe0] sm:$0xff] }
  0x4b   :  { %v679_v2 = vld [vmem:[%s3462_s5 + $0x7e8] sm:$0xff]  ;;  %v678_v4 = vld [vmem:[%s3462_s5 + $0x7e0] sm:$0xff]  ;;  %v448_v5 = vld [vmem:[%s3462_s5 + $0xb0] sm:$0xff] }
  0x4c   :  { %v672_v6 = vld [vmem:[%s3462_s5 + $0x7b0] sm:$0xff]  ;;  %v447_v7 = vld [vmem:[%s3462_s5 + $0xa8] sm:$0xff]  ;;  %v441_v9 = vld [vmem:[%s3462_s5 + $0x78] sm:$0xff] }
  0x4d   :  { %v671_v8 = vld [vmem:[%s3462_s5 + $0x7a8] sm:$0xff]  ;;  %v665_v10 = vld [vmem:[%s3462_s5 + $0x778] sm:$0xff]  ;;  %v440_v13 = vld [vmem:[%s3462_s5 + $0x70] sm:$0xff] }
  0xc8   :  { %v123_v17 = vpop.f32.mrf.mxu0 }
  0xc9   :  { %v124_v18 = vadd.f32 %v123_v17, %v39_v15  ;;  %v664_v15 = vld [vmem:[%s3462_s5 + $0x770] sm:$0xff]  ;;  %v658_v17 = vld [vmem:[%s3462_s5 + $0x740] sm:$0xff] }
  0xca   :  { %v125_v19 = vpop.f32.mrf.mxu0 }
  0xcb   :  { %v126_v20 = vadd.f32 %v125_v19, %v43_v16  ;;  %v128_v22 = vmax.f32 %v124_v18, 0.0  ;;  %v434_v16 = vld [vmem:[%s3462_s5 + $0x40] sm:$0xff]  ;;  %v433_v18 = vld [vmem:[%s3462_s5 + $0x38] sm:$0xff] }
  0xcc   :  { %v657_v19 = vld [vmem:[%s3462_s5 + $0x738] sm:$0xff] }
  0xcd   :  { %v129_v21 = vmax.f32 %v126_v20, 0.0  ;;  %v427_v20 = vld [vmem:[%s3462_s5 + $0x8] sm:$0xff] }
  0xcf   :  { %344 = vmatprep.mubr.f32.mxu1 %v129_v21  ;;  %415 = vmatprep.mubr.f32.mxu0 %v129_v21  ;;  %v651_v21 = vld [vmem:[%s3462_s5 + $0x708] sm:$0xff] }
  0xd0   :  { %345 = vmatmul.mubr.f32.vlgmr.msra.gmra.mxu1 %v128_v22  ;;  %416 = vmatmul.mubr.f32.vlgmr.msra.gmra.mxu0 %v128_v22  ;;  %v426_v22 = vld [vmem:[%s3462_s5] sm:$0xff] }
  0xd1   :  { %912 = vmatpush1.msra.mxu1 %v531_v23  ;;  %983 = vmatpush1.msra.mxu0 %v755_v24  ;;  %v650_v23 = vld [vmem:[%s3462_s5 + $0x700] sm:$0xff]  ;;  %v644_v24 = vld [vmem:[%s3462_s5 + $0x6d0] sm:$0xff] }
  0xd2   :  { %913 = vmatprep.subr.mxu1 %v525_v25  ;;  %984 = vmatprep.subr.mxu0 %v749_v26  ;;  %v868_v25 = vld [vmem:[%s3462_s5 + $0xdd0] sm:$0xff]  ;;  %v643_v26 = vld [vmem:[%s3462_s5 + $0x6c8] sm:$0xff] }
  0xd3   :  { %914 = vmatpush1.msra.mxu1 %v524_v27  ;;  %985 = vmatpush1.msra.mxu0 %v748_v28  ;;  %v867_v27 = vld [vmem:[%s3462_s5 + $0xdc8] sm:$0xff]  ;;  %v637_v28 = vld [vmem:[%s3462_s5 + $0x698] sm:$0xff] }
  0xd4   :  { %915 = vmatprep.subr.mxu1 %v518_v29  ;;  %986 = vmatprep.subr.mxu0 %v742_v30  ;;  %v861_v29 = vld [vmem:[%s3462_s5 + $0xd98] sm:$0xff]  ;;  %v636_v30 = vld [vmem:[%s3462_s5 + $0x690] sm:$0xff] }
  0xd5   :  { %916 = vmatpush1.msra.mxu1 %v517_v31  ;;  %987 = vmatpush1.msra.mxu0 %v741_v32  ;;  %v860_v31 = vld [vmem:[%s3462_s5 + $0xd90] sm:$0xff]  ;;  %v630_v32 = vld [vmem:[%s3462_s5 + $0x660] sm:$0xff] }
  0xd6   :  { %917 = vmatprep.subr.mxu1 %v511_v33  ;;  %988 = vmatprep.subr.mxu0 %v735_v34  ;;  %v854_v33 = vld [vmem:[%s3462_s5 + $0xd60] sm:$0xff]  ;;  %v629_v34 = vld [vmem:[%s3462_s5 + $0x658] sm:$0xff] }
  0xd7   :  { %918 = vmatpush1.msra.mxu1 %v510_v35  ;;  %989 = vmatpush1.msra.mxu0 %v734_v36  ;;  %v853_v35 = vld [vmem:[%s3462_s5 + $0xd58] sm:$0xff]  ;;  %v623_v36 = vld [vmem:[%s3462_s5 + $0x628] sm:$0xff] }
  0xd8   :  { %919 = vmatprep.subr.mxu1 %v504_v37  ;;  %990 = vmatprep.subr.mxu0 %v728_v38  ;;  %v847_v37 = vld [vmem:[%s3462_s5 + $0xd28] sm:$0xff]  ;;  %v622_v38 = vld [vmem:[%s3462_s5 + $0x620] sm:$0xff] }
  0xd9   :  { %920 = vmatpush1.msra.mxu1 %v503_v39  ;;  %991 = vmatpush1.msra.mxu0 %v727_v40  ;;  %v846_v39 = vld [vmem:[%s3462_s5 + $0xd20] sm:$0xff]  ;;  %v616_v40 = vld [vmem:[%s3462_s5 + $0x5f0] sm:$0xff] }
  0xda   :  { %921 = vmatprep.subr.mxu1 %v497_v41  ;;  %992 = vmatprep.subr.mxu0 %v721_v42  ;;  %v840_v41 = vld [vmem:[%s3462_s5 + $0xcf0] sm:$0xff]  ;;  %v615_v42 = vld [vmem:[%s3462_s5 + $0x5e8] sm:$0xff] }
  0xdb   :  { %922 = vmatpush1.msra.mxu1 %v496_v43  ;;  %993 = vmatpush1.msra.mxu0 %v720_v44  ;;  %v839_v43 = vld [vmem:[%s3462_s5 + $0xce8] sm:$0xff]  ;;  %v609_v44 = vld [vmem:[%s3462_s5 + $0x5b8] sm:$0xff] }
  0xdc   :  { %923 = vmatprep.subr.mxu1 %v490_v45  ;;  %994 = vmatprep.subr.mxu0 %v714_v46  ;;  %v833_v45 = vld [vmem:[%s3462_s5 + $0xcb8] sm:$0xff]  ;;  %v608_v46 = vld [vmem:[%s3462_s5 + $0x5b0] sm:$0xff] }
  0xdd   :  { %924 = vmatpush1.msra.mxu1 %v489_v47  ;;  %995 = vmatpush1.msra.mxu0 %v713_v48  ;;  %v832_v47 = vld [vmem:[%s3462_s5 + $0xcb0] sm:$0xff]  ;;  %v602_v48 = vld [vmem:[%s3462_s5 + $0x580] sm:$0xff] }
  0xde   :  { %925 = vmatprep.subr.mxu1 %v483_v49  ;;  %996 = vmatprep.subr.mxu0 %v707_v50  ;;  %v826_v49 = vld [vmem:[%s3462_s5 + $0xc80] sm:$0xff]  ;;  %v601_v50 = vld [vmem:[%s3462_s5 + $0x578] sm:$0xff] }
  0xdf   :  { %926 = vmatpush1.msra.mxu1 %v482_v51  ;;  %997 = vmatpush1.msra.mxu0 %v706_v52  ;;  %v825_v51 = vld [vmem:[%s3462_s5 + $0xc78] sm:$0xff]  ;;  %v595_v52 = vld [vmem:[%s3462_s5 + $0x548] sm:$0xff] }
  0xe0   :  { %927 = vmatprep.subr.mxu1 %v476_v53  ;;  %998 = vmatprep.subr.mxu0 %v700_v54  ;;  %v819_v53 = vld [vmem:[%s3462_s5 + $0xc48] sm:$0xff]  ;;  %v594_v54 = vld [vmem:[%s3462_s5 + $0x540] sm:$0xff] }
  0xe1   :  { %928 = vmatpush1.msra.mxu1 %v475_v55  ;;  %999 = vmatpush1.msra.mxu0 %v699_v56  ;;  %v818_v55 = vld [vmem:[%s3462_s5 + $0xc40] sm:$0xff]  ;;  %v588_v56 = vld [vmem:[%s3462_s5 + $0x510] sm:$0xff] }
  0xe2   :  { %929 = vmatprep.subr.mxu1 %v469_v57  ;;  %1000 = vmatprep.subr.mxu0 %v693_v58  ;;  %v812_v57 = vld [vmem:[%s3462_s5 + $0xc10] sm:$0xff]  ;;  %v587_v58 = vld [vmem:[%s3462_s5 + $0x508] sm:$0xff] }
  0xe3   :  { %930 = vmatpush1.msra.mxu1 %v468_v59  ;;  %1001 = vmatpush1.msra.mxu0 %v692_v60  ;;  %v811_v59 = vld [vmem:[%s3462_s5 + $0xc08] sm:$0xff]  ;;  %v581_v60 = vld [vmem:[%s3462_s5 + $0x4d8] sm:$0xff] }
  0xe4   :  { %931 = vmatprep.subr.mxu1 %v462_v61  ;;  %1002 = vmatprep.subr.mxu0 %v686_v62  ;;  %v805_v61 = vld [vmem:[%s3462_s5 + $0xbd8] sm:$0xff]  ;;  %v580_v62 = vld [vmem:[%s3462_s5 + $0x4d0] sm:$0xff] }
  0xe5   :  { %932 = vmatpush1.msra.mxu1 %v461_v63  ;;  %1003 = vmatpush1.msra.mxu0 %v685_v0  ;;  %v804_v63 = vld [vmem:[%s3462_s5 + $0xbd0] sm:$0xff]  ;;  %v574_v0 = vld [vmem:[%s3462_s5 + $0x4a0] sm:$0xff] }
  0xe6   :  { %933 = vmatprep.subr.mxu1 %v455_v1  ;;  %1004 = vmatprep.subr.mxu0 %v679_v2  ;;  %v798_v1 = vld [vmem:[%s3462_s5 + $0xba0] sm:$0xff]  ;;  %v573_v2 = vld [vmem:[%s3462_s5 + $0x498] sm:$0xff] }
  0xe7   :  { %934 = vmatpush1.msra.mxu1 %v454_v3  ;;  %1005 = vmatpush1.msra.mxu0 %v678_v4  ;;  %v797_v3 = vld [vmem:[%s3462_s5 + $0xb98] sm:$0xff]  ;;  %v567_v4 = vld [vmem:[%s3462_s5 + $0x468] sm:$0xff] }
  0xe8   :  { %935 = vmatprep.subr.mxu1 %v448_v5  ;;  %1006 = vmatprep.subr.mxu0 %v672_v6  ;;  %v791_v5 = vld [vmem:[%s3462_s5 + $0xb68] sm:$0xff]  ;;  %v566_v6 = vld [vmem:[%s3462_s5 + $0x460] sm:$0xff] }
  0xe9   :  { %936 = vmatpush1.msra.mxu1 %v447_v7  ;;  %1007 = vmatpush1.msra.mxu0 %v671_v8  ;;  %v790_v7 = vld [vmem:[%s3462_s5 + $0xb60] sm:$0xff]  ;;  %v560_v8 = vld [vmem:[%s3462_s5 + $0x430] sm:$0xff] }
  0xea   :  { %937 = vmatprep.subr.mxu1 %v441_v9  ;;  %1008 = vmatprep.subr.mxu0 %v665_v10  ;;  %v784_v9 = vld [vmem:[%s3462_s5 + $0xb30] sm:$0xff]  ;;  %v559_v10 = vld [vmem:[%s3462_s5 + $0x428] sm:$0xff] }
  0xeb   :  { %938 = vmatpush1.msra.mxu1 %v440_v13  ;;  %1009 = vmatpush1.msra.mxu0 %v664_v15  ;;  %v783_v13 = vld [vmem:[%s3462_s5 + $0xb28] sm:$0xff]  ;;  %v553_v15 = vld [vmem:[%s3462_s5 + $0x3f8] sm:$0xff] }
  0xec   :  { %939 = vmatprep.subr.mxu1 %v434_v16  ;;  %1010 = vmatprep.subr.mxu0 %v658_v17  ;;  %v777_v16 = vld [vmem:[%s3462_s5 + $0xaf8] sm:$0xff]  ;;  %v552_v17 = vld [vmem:[%s3462_s5 + $0x3f0] sm:$0xff] }
  0xed   :  { %940 = vmatpush1.msra.mxu1 %v433_v18  ;;  %1011 = vmatpush1.msra.mxu0 %v657_v19  ;;  %v776_v18 = vld [vmem:[%s3462_s5 + $0xaf0] sm:$0xff]  ;;  %v546_v19 = vld [vmem:[%s3462_s5 + $0x3c0] sm:$0xff] }
  0xee   :  { %941 = vmatprep.subr.mxu1 %v427_v20  ;;  %1012 = vmatprep.subr.mxu0 %v651_v21  ;;  %v770_v20 = vld [vmem:[%s3462_s5 + $0xac0] sm:$0xff]  ;;  %v545_v21 = vld [vmem:[%s3462_s5 + $0x3b8] sm:$0xff] }
  0xef   :  { %942 = vmatpush1.msra.mxu1 %v426_v22  ;;  %1013 = vmatpush1.msra.mxu0 %v650_v23  ;;  %v769_v22 = vld [vmem:[%s3462_s5 + $0xab8] sm:$0xff]  ;;  %v539_v23 = vld [vmem:[%s3462_s5 + $0x388] sm:$0xff] }
  0xf0   :  { %943 = vmatprep.subr.mxu1 %v644_v24  ;;  %1014 = vmatprep.subr.mxu0 %v868_v25  ;;  %v763_v24 = vld [vmem:[%s3462_s5 + $0xa88] sm:$0xff]  ;;  %v538_v25 = vld [vmem:[%s3462_s5 + $0x380] sm:$0xff] }
  0xf1   :  { %944 = vmatpush2.msra.mxu1 %v643_v26  ;;  %1015 = vmatpush2.msra.mxu0 %v867_v27  ;;  %v762_v26 = vld [vmem:[%s3462_s5 + $0xa80] sm:$0xff] }
  0xf2   :  { %945 = vmatprep.subr.mxu1 %v637_v28  ;;  %1016 = vmatprep.subr.mxu0 %v861_v29  ;;  %v534_v27 = vld [vmem:[%s3462_s5 + $0x360] sm:$0xff]  ;;  %v270_v29 = vsub.s32 2, %v2056_v11 }
  0xf3   :  { %946 = vmatpush2.msra.mxu1 %v636_v30  ;;  %1017 = vmatpush2.msra.mxu0 %v860_v31  ;;  %v758_v28 = vld [vmem:[%s3462_s5 + $0xa60] sm:$0xff]  ;;  %v274_v31 = vsub.s32 3, %v2056_v11 }
  0xf4   :  { %947 = vmatprep.subr.mxu1 %v630_v32  ;;  %1018 = vmatprep.subr.mxu0 %v854_v33  ;;  %v258_v30 = vld [vmem:[%s3461_s4] sm:$0xf] }
  0xf5   :  { %948 = vmatpush2.msra.mxu1 %v629_v34  ;;  %1019 = vmatpush2.msra.mxu0 %v853_v35  ;;  %v263_v32 = vrot.slane %v258_v30, %v2059_v12  ;;  %v271_v33 = vrot.slane %v258_v30, %v270_v29  ;;  %v267_v34 = vrot.slane %v258_v30, %v2065_v14 }
  0xf6   :  { %949 = vmatprep.subr.mxu1 %v623_v36  ;;  %1020 = vmatprep.subr.mxu0 %v847_v37  ;;  %v275_v35 = vrot.slane %v258_v30, %v274_v31  ;;  %v457_v30 = vld [vmem:[%s3462_s5 + $0xf8] sm:$0xff] }
  0xf7   :  { %950 = vmatpush2.msra.mxu1 %v622_v38  ;;  %1021 = vmatpush2.msra.mxu0 %v846_v39 }
  0xf8   :  { %951 = vmatprep.subr.mxu1 %v616_v40  ;;  %1022 = vmatprep.subr.mxu0 %v840_v41 }
  0xf9   :  { %952 = vmatpush2.msra.mxu1 %v615_v42  ;;  %1023 = vmatpush2.msra.mxu0 %v839_v43 }
  0xfa   :  { %953 = vmatprep.subr.mxu1 %v609_v44  ;;  %1024 = vmatprep.subr.mxu0 %v833_v45 }
  0xfb   :  { %954 = vmatpush2.msra.mxu1 %v608_v46  ;;  %1025 = vmatpush2.msra.mxu0 %v832_v47 }
  0xfc   :  { %955 = vmatprep.subr.mxu1 %v602_v48  ;;  %1026 = vmatprep.subr.mxu0 %v826_v49  ;;  %v533_v48 = vld [vmem:[%s3462_s5 + $0x358] sm:$0xff] }
  0xfd   :  { %956 = vmatpush2.msra.mxu1 %v601_v50  ;;  %1027 = vmatpush2.msra.mxu0 %v825_v51  ;;  %v757_v49 = vld [vmem:[%s3462_s5 + $0xa58] sm:$0xff]  ;;  %v527_v50 = vld [vmem:[%s3462_s5 + $0x328] sm:$0xff] }
  0xfe   :  { %957 = vmatprep.subr.mxu1 %v595_v52  ;;  %1028 = vmatprep.subr.mxu0 %v819_v53  ;;  %v751_v51 = vld [vmem:[%s3462_s5 + $0xa28] sm:$0xff]  ;;  %v526_v52 = vld [vmem:[%s3462_s5 + $0x320] sm:$0xff] }
  0xff   :  { %958 = vmatpush2.msra.mxu1 %v594_v54  ;;  %1029 = vmatpush2.msra.mxu0 %v818_v55  ;;  %v750_v53 = vld [vmem:[%s3462_s5 + $0xa20] sm:$0xff]  ;;  %v520_v54 = vld [vmem:[%s3462_s5 + $0x2f0] sm:$0xff] }
 0x100   :  { %959 = vmatprep.subr.mxu1 %v588_v56  ;;  %1030 = vmatprep.subr.mxu0 %v812_v57  ;;  %v744_v55 = vld [vmem:[%s3462_s5 + $0x9f0] sm:$0xff]  ;;  %v519_v56 = vld [vmem:[%s3462_s5 + $0x2e8] sm:$0xff] }
 0x101   :  { %960 = vmatpush2.msra.mxu1 %v587_v58  ;;  %1031 = vmatpush2.msra.mxu0 %v811_v59  ;;  %v743_v57 = vld [vmem:[%s3462_s5 + $0x9e8] sm:$0xff]  ;;  %v513_v58 = vld [vmem:[%s3462_s5 + $0x2b8] sm:$0xff] }
 0x102   :  { %961 = vmatprep.subr.mxu1 %v581_v60  ;;  %1032 = vmatprep.subr.mxu0 %v805_v61  ;;  %v737_v59 = vld [vmem:[%s3462_s5 + $0x9b8] sm:$0xff]  ;;  %v512_v60 = vld [vmem:[%s3462_s5 + $0x2b0] sm:$0xff] }
 0x103   :  { %962 = vmatpush2.msra.mxu1 %v580_v62  ;;  %1033 = vmatpush2.msra.mxu0 %v804_v63  ;;  %v736_v61 = vld [vmem:[%s3462_s5 + $0x9b0] sm:$0xff]  ;;  %v506_v62 = vld [vmem:[%s3462_s5 + $0x280] sm:$0xff] }
 0x104   :  { %963 = vmatprep.subr.mxu1 %v574_v0  ;;  %1034 = vmatprep.subr.mxu0 %v798_v1  ;;  %v730_v63 = vld [vmem:[%s3462_s5 + $0x980] sm:$0xff]  ;;  %v505_v0 = vld [vmem:[%s3462_s5 + $0x278] sm:$0xff] }
 0x105   :  { %964 = vmatpush2.msra.mxu1 %v573_v2  ;;  %1035 = vmatpush2.msra.mxu0 %v797_v3  ;;  %v729_v1 = vld [vmem:[%s3462_s5 + $0x978] sm:$0xff]  ;;  %v499_v2 = vld [vmem:[%s3462_s5 + $0x248] sm:$0xff] }
 0x106   :  { %965 = vmatprep.subr.mxu1 %v567_v4  ;;  %1036 = vmatprep.subr.mxu0 %v791_v5  ;;  %v723_v3 = vld [vmem:[%s3462_s5 + $0x948] sm:$0xff]  ;;  %v498_v4 = vld [vmem:[%s3462_s5 + $0x240] sm:$0xff] }
 0x107   :  { %966 = vmatpush2.msra.mxu1 %v566_v6  ;;  %1037 = vmatpush2.msra.mxu0 %v790_v7  ;;  %v722_v5 = vld [vmem:[%s3462_s5 + $0x940] sm:$0xff]  ;;  %v492_v6 = vld [vmem:[%s3462_s5 + $0x210] sm:$0xff] }
 0x108   :  { %967 = vmatprep.subr.mxu1 %v560_v8  ;;  %1038 = vmatprep.subr.mxu0 %v784_v9  ;;  %v716_v7 = vld [vmem:[%s3462_s5 + $0x910] sm:$0xff]  ;;  %v491_v8 = vld [vmem:[%s3462_s5 + $0x208] sm:$0xff] }
 0x109   :  { %968 = vmatpush2.msra.mxu1 %v559_v10  ;;  %1039 = vmatpush2.msra.mxu0 %v783_v13  ;;  %v715_v9 = vld [vmem:[%s3462_s5 + $0x908] sm:$0xff]  ;;  %v485_v10 = vld [vmem:[%s3462_s5 + $0x1d8] sm:$0xff] }
 0x10a   :  { %969 = vmatprep.subr.mxu1 %v553_v15  ;;  %1040 = vmatprep.subr.mxu0 %v777_v16  ;;  %v709_v13 = vld [vmem:[%s3462_s5 + $0x8d8] sm:$0xff]  ;;  %v484_v15 = vld [vmem:[%s3462_s5 + $0x1d0] sm:$0xff] }
 0x10b   :  { %970 = vmatpush2.msra.mxu1 %v552_v17  ;;  %1041 = vmatpush2.msra.mxu0 %v776_v18  ;;  %v708_v16 = vld [vmem:[%s3462_s5 + $0x8d0] sm:$0xff]  ;;  %v478_v17 = vld [vmem:[%s3462_s5 + $0x1a0] sm:$0xff] }
 0x10c   :  { %971 = vmatprep.subr.mxu1 %v546_v19  ;;  %1042 = vmatprep.subr.mxu0 %v770_v20  ;;  %v702_v18 = vld [vmem:[%s3462_s5 + $0x8a0] sm:$0xff]  ;;  %v477_v19 = vld [vmem:[%s3462_s5 + $0x198] sm:$0xff] }
 0x10d   :  { %972 = vmatpush2.msra.mxu1 %v545_v21  ;;  %1043 = vmatpush2.msra.mxu0 %v769_v22  ;;  %v701_v20 = vld [vmem:[%s3462_s5 + $0x898] sm:$0xff]  ;;  %v471_v21 = vld [vmem:[%s3462_s5 + $0x168] sm:$0xff] }
 0x10e   :  { %973 = vmatprep.subr.mxu1 %v539_v23  ;;  %1044 = vmatprep.subr.mxu0 %v763_v24  ;;  %v695_v22 = vld [vmem:[%s3462_s5 + $0x868] sm:$0xff]  ;;  %v470_v23 = vld [vmem:[%s3462_s5 + $0x160] sm:$0xff] }
 0x10f   :  { %974 = vmatpush2.msra.mxu1 %v538_v25  ;;  %1045 = vmatpush2.msra.mxu0 %v762_v26  ;;  %v694_v24 = vld [vmem:[%s3462_s5 + $0x860] sm:$0xff]  ;;  %v464_v25 = vld [vmem:[%s3462_s5 + $0x130] sm:$0xff] }
 0x110   :  { %1053 = vmatprep.subr.mxu1 %v534_v27  ;;  %1124 = vmatprep.subr.mxu0 %v758_v28  ;;  %v688_v26 = vld [vmem:[%s3462_s5 + $0x830] sm:$0xff]  ;;  %v463_v27 = vld [vmem:[%s3462_s5 + $0x128] sm:$0xff] }
 0x111   :  { %v687_v28 = vld [vmem:[%s3462_s5 + $0x828] sm:$0xff] }
 0x190   :  { %v346_v36 = vpop.f32.mrf.mxu1  ;;  %v417_v37 = vpop.f32.mrf.mxu0 }
 0x191   :  { %v347_v38 = vadd.f32 %v346_v36, %v263_v32  ;;  %v418_v39 = vadd.f32 %v417_v37, %v271_v33  ;;  %v681_v32 = vld [vmem:[%s3462_s5 + $0x7f8] sm:$0xff]  ;;  %v456_v33 = vld [vmem:[%s3462_s5 + $0xf0] sm:$0xff]  ;;  %v674_v36 = vld [vmem:[%s3462_s5 + $0x7c0] sm:$0xff] }
 0x192   :  { %v348_v40 = vpop.f32.mrf.mxu1  ;;  %v419_v41 = vpop.f32.mrf.mxu0  ;;  %v449_v37 = vld [vmem:[%s3462_s5 + $0xb8] sm:$0xff] }
 0x193   :  { %v349_v42 = vadd.f32 %v348_v40, %v267_v34  ;;  %v420_v43 = vadd.f32 %v419_v41, %v275_v35  ;;  %v2468_v46 = vmax.f32 %v347_v38, 0.0  ;;  %v2470_v47 = vmax.f32 %v418_v39, 0.0  ;;  %v680_v34 = vld [vmem:[%s3462_s5 + $0x7f0] sm:$0xff]  ;;  %v450_v35 = vld [vmem:[%s3462_s5 + $0xc0] sm:$0xff]  ;;  %v673_v38 = vld [vmem:[%s3462_s5 + $0x7b8] sm:$0xff] }
 0x194   :  { %v443_v39 = vld [vmem:[%s3462_s5 + $0x88] sm:$0xff]  ;;  %v442_v41 = vld [vmem:[%s3462_s5 + $0x80] sm:$0xff] }
 0x195   :  { %v2464_v44 = vmax.f32 %v349_v42, 0.0  ;;  %v2466_v45 = vmax.f32 %v420_v43, 0.0  ;;  %v667_v40 = vld [vmem:[%s3462_s5 + $0x788] sm:$0xff]  ;;  %v666_v42 = vld [vmem:[%s3462_s5 + $0x780] sm:$0xff]  ;;  %v436_v43 = vld [vmem:[%s3462_s5 + $0x50] sm:$0xff] }
 0x197   :  { %975 = vmatprep.mubr.f32.mxu1 %v2464_v44  ;;  %1046 = vmatprep.mubr.f32.mxu0 %v2466_v45 }
 0x198   :  { %976 = vmatmul.mubr.f32.vlgmr.msra.gmra.mxu1 %v2468_v46  ;;  %1047 = vmatmul.mubr.f32.vlgmr.msra.gmra.mxu0 %v2470_v47 }
 0x199   :  { %1054 = vmatpush1.msra.mxu1 %v533_v48  ;;  %1125 = vmatpush1.msra.mxu0 %v757_v49  ;;  %v660_v48 = vld [vmem:[%s3462_s5 + $0x750] sm:$0xff]  ;;  %v435_v49 = vld [vmem:[%s3462_s5 + $0x48] sm:$0xff] }
 0x19a   :  { %1055 = vmatprep.subr.mxu1 %v527_v50  ;;  %1117 = vmatprep.mubr.f32.mxu1 %v2464_v44  ;;  %v659_v50 = vld [vmem:[%s3462_s5 + $0x748] sm:$0xff] }
 0x19b   :  { %1126 = vmatprep.subr.mxu0 %v751_v51  ;;  %1188 = vmatprep.mubr.f32.mxu0 %v2466_v45  ;;  %v429_v51 = vld [vmem:[%s3462_s5 + $0x18] sm:$0xff] }
 0x19c   :  { %1056 = vmatpush1.msra.mxu1 %v526_v52  ;;  %1127 = vmatpush1.msra.mxu0 %v750_v53  ;;  %v653_v52 = vld [vmem:[%s3462_s5 + $0x718] sm:$0xff]  ;;  %v428_v53 = vld [vmem:[%s3462_s5 + $0x10] sm:$0xff] }
 0x19d   :  { %1057 = vmatprep.subr.mxu1 %v520_v54  ;;  %1128 = vmatprep.subr.mxu0 %v744_v55  ;;  %v652_v54 = vld [vmem:[%s3462_s5 + $0x710] sm:$0xff]  ;;  %v646_v55 = vld [vmem:[%s3462_s5 + $0x6e0] sm:$0xff] }
 0x19e   :  { %1058 = vmatpush1.msra.mxu1 %v519_v56  ;;  %1129 = vmatpush1.msra.mxu0 %v743_v57  ;;  %v870_v56 = vld [vmem:[%s3462_s5 + $0xde0] sm:$0xff]  ;;  %v645_v57 = vld [vmem:[%s3462_s5 + $0x6d8] sm:$0xff] }
 0x19f   :  { %1059 = vmatprep.subr.mxu1 %v513_v58  ;;  %1130 = vmatprep.subr.mxu0 %v737_v59  ;;  %v869_v58 = vld [vmem:[%s3462_s5 + $0xdd8] sm:$0xff]  ;;  %v639_v59 = vld [vmem:[%s3462_s5 + $0x6a8] sm:$0xff] }
 0x1a0   :  { %1060 = vmatpush1.msra.mxu1 %v512_v60  ;;  %1131 = vmatpush1.msra.mxu0 %v736_v61  ;;  %v863_v60 = vld [vmem:[%s3462_s5 + $0xda8] sm:$0xff]  ;;  %v638_v61 = vld [vmem:[%s3462_s5 + $0x6a0] sm:$0xff] }
 0x1a1   :  { %1061 = vmatprep.subr.mxu1 %v506_v62  ;;  %1132 = vmatprep.subr.mxu0 %v730_v63  ;;  %v862_v62 = vld [vmem:[%s3462_s5 + $0xda0] sm:$0xff]  ;;  %v632_v63 = vld [vmem:[%s3462_s5 + $0x670] sm:$0xff] }
 0x1a2   :  { %1062 = vmatpush1.msra.mxu1 %v505_v0  ;;  %1133 = vmatpush1.msra.mxu0 %v729_v1  ;;  %v856_v0 = vld [vmem:[%s3462_s5 + $0xd70] sm:$0xff]  ;;  %v631_v1 = vld [vmem:[%s3462_s5 + $0x668] sm:$0xff] }
 0x1a3   :  { %1063 = vmatprep.subr.mxu1 %v499_v2  ;;  %1134 = vmatprep.subr.mxu0 %v723_v3  ;;  %v855_v2 = vld [vmem:[%s3462_s5 + $0xd68] sm:$0xff]  ;;  %v625_v3 = vld [vmem:[%s3462_s5 + $0x638] sm:$0xff] }
 0x1a4   :  { %1064 = vmatpush1.msra.mxu1 %v498_v4  ;;  %1135 = vmatpush1.msra.mxu0 %v722_v5  ;;  %v849_v4 = vld [vmem:[%s3462_s5 + $0xd38] sm:$0xff]  ;;  %v624_v5 = vld [vmem:[%s3462_s5 + $0x630] sm:$0xff] }
 0x1a5   :  { %1065 = vmatprep.subr.mxu1 %v492_v6  ;;  %1136 = vmatprep.subr.mxu0 %v716_v7  ;;  %v848_v6 = vld [vmem:[%s3462_s5 + $0xd30] sm:$0xff]  ;;  %v618_v7 = vld [vmem:[%s3462_s5 + $0x600] sm:$0xff] }
 0x1a6   :  { %1066 = vmatpush1.msra.mxu1 %v491_v8  ;;  %1137 = vmatpush1.msra.mxu0 %v715_v9  ;;  %v842_v8 = vld [vmem:[%s3462_s5 + $0xd00] sm:$0xff]  ;;  %v617_v9 = vld [vmem:[%s3462_s5 + $0x5f8] sm:$0xff] }
 0x1a7   :  { %1067 = vmatprep.subr.mxu1 %v485_v10  ;;  %1138 = vmatprep.subr.mxu0 %v709_v13  ;;  %v841_v10 = vld [vmem:[%s3462_s5 + $0xcf8] sm:$0xff]  ;;  %v611_v13 = vld [vmem:[%s3462_s5 + $0x5c8] sm:$0xff] }
 0x1a8   :  { %1068 = vmatpush1.msra.mxu1 %v484_v15  ;;  %1139 = vmatpush1.msra.mxu0 %v708_v16  ;;  %v835_v15 = vld [vmem:[%s3462_s5 + $0xcc8] sm:$0xff]  ;;  %v610_v16 = vld [vmem:[%s3462_s5 + $0x5c0] sm:$0xff] }
 0x1a9   :  { %1069 = vmatprep.subr.mxu1 %v478_v17  ;;  %1140 = vmatprep.subr.mxu0 %v702_v18  ;;  %v834_v17 = vld [vmem:[%s3462_s5 + $0xcc0] sm:$0xff]  ;;  %v604_v18 = vld [vmem:[%s3462_s5 + $0x590] sm:$0xff] }
 0x1aa   :  { %1070 = vmatpush1.msra.mxu1 %v477_v19  ;;  %1141 = vmatpush1.msra.mxu0 %v701_v20  ;;  %v828_v19 = vld [vmem:[%s3462_s5 + $0xc90] sm:$0xff]  ;;  %v603_v20 = vld [vmem:[%s3462_s5 + $0x588] sm:$0xff] }
 0x1ab   :  { %1071 = vmatprep.subr.mxu1 %v471_v21  ;;  %1142 = vmatprep.subr.mxu0 %v695_v22  ;;  %v827_v21 = vld [vmem:[%s3462_s5 + $0xc88] sm:$0xff]  ;;  %v597_v22 = vld [vmem:[%s3462_s5 + $0x558] sm:$0xff] }
 0x1ac   :  { %1072 = vmatpush1.msra.mxu1 %v470_v23  ;;  %1143 = vmatpush1.msra.mxu0 %v694_v24  ;;  %v821_v23 = vld [vmem:[%s3462_s5 + $0xc58] sm:$0xff]  ;;  %v596_v24 = vld [vmem:[%s3462_s5 + $0x550] sm:$0xff] }
 0x1ad   :  { %1073 = vmatprep.subr.mxu1 %v464_v25  ;;  %1144 = vmatprep.subr.mxu0 %v688_v26  ;;  %v820_v25 = vld [vmem:[%s3462_s5 + $0xc50] sm:$0xff]  ;;  %v590_v26 = vld [vmem:[%s3462_s5 + $0x520] sm:$0xff] }
 0x1ae   :  { %1074 = vmatpush1.msra.mxu1 %v463_v27  ;;  %1145 = vmatpush1.msra.mxu0 %v687_v28  ;;  %v814_v27 = vld [vmem:[%s3462_s5 + $0xc20] sm:$0xff]  ;;  %v589_v28 = vld [vmem:[%s3462_s5 + $0x518] sm:$0xff] }
 0x1af   :  { %1075 = vmatprep.subr.mxu1 %v457_v30  ;;  %1146 = vmatprep.subr.mxu0 %v681_v32  ;;  %v813_v30 = vld [vmem:[%s3462_s5 + $0xc18] sm:$0xff]  ;;  %v583_v32 = vld [vmem:[%s3462_s5 + $0x4e8] sm:$0xff] }
 0x1b0   :  { %1076 = vmatpush1.msra.mxu1 %v456_v33  ;;  %1147 = vmatpush1.msra.mxu0 %v680_v34  ;;  %v807_v33 = vld [vmem:[%s3462_s5 + $0xbe8] sm:$0xff]  ;;  %v582_v34 = vld [vmem:[%s3462_s5 + $0x4e0] sm:$0xff] }
 0x1b1   :  { %1077 = vmatprep.subr.mxu1 %v450_v35  ;;  %1148 = vmatprep.subr.mxu0 %v674_v36  ;;  %v806_v35 = vld [vmem:[%s3462_s5 + $0xbe0] sm:$0xff]  ;;  %v576_v36 = vld [vmem:[%s3462_s5 + $0x4b0] sm:$0xff] }
 0x1b2   :  { %1078 = vmatpush1.msra.mxu1 %v449_v37  ;;  %1149 = vmatpush1.msra.mxu0 %v673_v38  ;;  %v800_v37 = vld [vmem:[%s3462_s5 + $0xbb0] sm:$0xff]  ;;  %v575_v38 = vld [vmem:[%s3462_s5 + $0x4a8] sm:$0xff] }
 0x1b3   :  { %1079 = vmatprep.subr.mxu1 %v443_v39  ;;  %1150 = vmatprep.subr.mxu0 %v667_v40  ;;  %v799_v39 = vld [vmem:[%s3462_s5 + $0xba8] sm:$0xff]  ;;  %v569_v40 = vld [vmem:[%s3462_s5 + $0x478] sm:$0xff] }
 0x1b4   :  { %1080 = vmatpush1.msra.mxu1 %v442_v41  ;;  %1151 = vmatpush1.msra.mxu0 %v666_v42  ;;  %v793_v41 = vld [vmem:[%s3462_s5 + $0xb78] sm:$0xff]  ;;  %v568_v42 = vld [vmem:[%s3462_s5 + $0x470] sm:$0xff] }
 0x1b5   :  { %1081 = vmatprep.subr.mxu1 %v436_v43  ;;  %1152 = vmatprep.subr.mxu0 %v660_v48  ;;  %v792_v43 = vld [vmem:[%s3462_s5 + $0xb70] sm:$0xff]  ;;  %v562_v48 = vld [vmem:[%s3462_s5 + $0x440] sm:$0xff] }
 0x1b6   :  { %1082 = vmatpush1.msra.mxu1 %v435_v49  ;;  %1153 = vmatpush1.msra.mxu0 %v659_v50  ;;  %v786_v49 = vld [vmem:[%s3462_s5 + $0xb40] sm:$0xff]  ;;  %v561_v50 = vld [vmem:[%s3462_s5 + $0x438] sm:$0xff] }
 0x1b7   :  { %1083 = vmatprep.subr.mxu1 %v429_v51  ;;  %1154 = vmatprep.subr.mxu0 %v653_v52  ;;  %v785_v51 = vld [vmem:[%s3462_s5 + $0xb38] sm:$0xff]  ;;  %v555_v52 = vld [vmem:[%s3462_s5 + $0x408] sm:$0xff] }
 0x1b8   :  { %1084 = vmatpush1.msra.mxu1 %v428_v53  ;;  %1155 = vmatpush1.msra.mxu0 %v652_v54  ;;  %v779_v53 = vld [vmem:[%s3462_s5 + $0xb08] sm:$0xff]  ;;  %v554_v54 = vld [vmem:[%s3462_s5 + $0x400] sm:$0xff] }
 0x1b9   :  { %1085 = vmatprep.subr.mxu1 %v646_v55  ;;  %1156 = vmatprep.subr.mxu0 %v870_v56  ;;  %v778_v55 = vld [vmem:[%s3462_s5 + $0xb00] sm:$0xff]  ;;  %v548_v56 = vld [vmem:[%s3462_s5 + $0x3d0] sm:$0xff] }
 0x1ba   :  { %1086 = vmatpush2.msra.mxu1 %v645_v57  ;;  %1157 = vmatpush2.msra.mxu0 %v869_v58  ;;  %v772_v57 = vld [vmem:[%s3462_s5 + $0xad0] sm:$0xff]  ;;  %v547_v58 = vld [vmem:[%s3462_s5 + $0x3c8] sm:$0xff] }
 0x1bb   :  { %1087 = vmatprep.subr.mxu1 %v639_v59  ;;  %1158 = vmatprep.subr.mxu0 %v863_v60  ;;  %v771_v59 = vld [vmem:[%s3462_s5 + $0xac8] sm:$0xff]  ;;  %v541_v60 = vld [vmem:[%s3462_s5 + $0x398] sm:$0xff] }
 0x1bc   :  { %1088 = vmatpush2.msra.mxu1 %v638_v61  ;;  %1159 = vmatpush2.msra.mxu0 %v862_v62  ;;  %v765_v61 = vld [vmem:[%s3462_s5 + $0xa98] sm:$0xff]  ;;  %v540_v62 = vld [vmem:[%s3462_s5 + $0x390] sm:$0xff] }
 0x1bd   :  { %1089 = vmatprep.subr.mxu1 %v632_v63  ;;  %1160 = vmatprep.subr.mxu0 %v856_v0  ;;  %v764_v63 = vld [vmem:[%s3462_s5 + $0xa90] sm:$0xff] }
 0x1be   :  { %1090 = vmatpush2.msra.mxu1 %v631_v1  ;;  %1161 = vmatpush2.msra.mxu0 %v855_v2  ;;  %v536_v0 = vld [vmem:[%s3462_s5 + $0x370] sm:$0xff]  ;;  %v535_v2 = vld [vmem:[%s3462_s5 + $0x368] sm:$0xff] }
 0x1bf   :  { %1091 = vmatprep.subr.mxu1 %v625_v3  ;;  %1162 = vmatprep.subr.mxu0 %v849_v4  ;;  %v760_v1 = vld [vmem:[%s3462_s5 + $0xa70] sm:$0xff]  ;;  %v759_v3 = vld [vmem:[%s3462_s5 + $0xa68] sm:$0xff]  ;;  %v529_v4 = vld [vmem:[%s3462_s5 + $0x338] sm:$0xff] }
 0x1c0   :  { %1092 = vmatpush2.msra.mxu1 %v624_v5  ;;  %1163 = vmatpush2.msra.mxu0 %v848_v6  ;;  %v753_v5 = vld [vmem:[%s3462_s5 + $0xa38] sm:$0xff]  ;;  %v528_v6 = vld [vmem:[%s3462_s5 + $0x330] sm:$0xff] }
 0x1c1   :  { %1093 = vmatprep.subr.mxu1 %v618_v7  ;;  %1164 = vmatprep.subr.mxu0 %v842_v8  ;;  %v752_v7 = vld [vmem:[%s3462_s5 + $0xa30] sm:$0xff]  ;;  %v522_v8 = vld [vmem:[%s3462_s5 + $0x300] sm:$0xff] }
 0x1c2   :  { %1094 = vmatpush2.msra.mxu1 %v617_v9  ;;  %1165 = vmatpush2.msra.mxu0 %v841_v10  ;;  %v746_v9 = vld [vmem:[%s3462_s5 + $0xa00] sm:$0xff]  ;;  %v521_v10 = vld [vmem:[%s3462_s5 + $0x2f8] sm:$0xff] }
 0x1c3   :  { %1095 = vmatprep.subr.mxu1 %v611_v13  ;;  %1166 = vmatprep.subr.mxu0 %v835_v15  ;;  %v745_v13 = vld [vmem:[%s3462_s5 + $0x9f8] sm:$0xff]  ;;  %v515_v15 = vld [vmem:[%s3462_s5 + $0x2c8] sm:$0xff] }
 0x1c4   :  { %1096 = vmatpush2.msra.mxu1 %v610_v16  ;;  %1167 = vmatpush2.msra.mxu0 %v834_v17  ;;  %v739_v16 = vld [vmem:[%s3462_s5 + $0x9c8] sm:$0xff]  ;;  %v514_v17 = vld [vmem:[%s3462_s5 + $0x2c0] sm:$0xff] }
 0x1c5   :  { %1097 = vmatprep.subr.mxu1 %v604_v18  ;;  %1168 = vmatprep.subr.mxu0 %v828_v19  ;;  %v738_v18 = vld [vmem:[%s3462_s5 + $0x9c0] sm:$0xff]  ;;  %v508_v19 = vld [vmem:[%s3462_s5 + $0x290] sm:$0xff] }
 0x1c6   :  { %1098 = vmatpush2.msra.mxu1 %v603_v20  ;;  %1169 = vmatpush2.msra.mxu0 %v827_v21  ;;  %v732_v20 = vld [vmem:[%s3462_s5 + $0x990] sm:$0xff]  ;;  %v507_v21 = vld [vmem:[%s3462_s5 + $0x288] sm:$0xff] }
 0x1c7   :  { %1099 = vmatprep.subr.mxu1 %v597_v22  ;;  %1170 = vmatprep.subr.mxu0 %v821_v23  ;;  %v731_v22 = vld [vmem:[%s3462_s5 + $0x988] sm:$0xff]  ;;  %v501_v23 = vld [vmem:[%s3462_s5 + $0x258] sm:$0xff] }
 0x1c8   :  { %1100 = vmatpush2.msra.mxu1 %v596_v24  ;;  %1171 = vmatpush2.msra.mxu0 %v820_v25  ;;  %v725_v24 = vld [vmem:[%s3462_s5 + $0x958] sm:$0xff]  ;;  %v500_v25 = vld [vmem:[%s3462_s5 + $0x250] sm:$0xff] }
 0x1c9   :  { %1101 = vmatprep.subr.mxu1 %v590_v26  ;;  %1172 = vmatprep.subr.mxu0 %v814_v27  ;;  %v724_v26 = vld [vmem:[%s3462_s5 + $0x950] sm:$0xff]  ;;  %v494_v27 = vld [vmem:[%s3462_s5 + $0x220] sm:$0xff] }
 0x1ca   :  { %1102 = vmatpush2.msra.mxu1 %v589_v28  ;;  %1173 = vmatpush2.msra.mxu0 %v813_v30  ;;  %v718_v28 = vld [vmem:[%s3462_s5 + $0x920] sm:$0xff]  ;;  %v493_v30 = vld [vmem:[%s3462_s5 + $0x218] sm:$0xff] }
 0x1cb   :  { %1103 = vmatprep.subr.mxu1 %v583_v32  ;;  %1174 = vmatprep.subr.mxu0 %v807_v33  ;;  %v717_v32 = vld [vmem:[%s3462_s5 + $0x918] sm:$0xff]  ;;  %v487_v33 = vld [vmem:[%s3462_s5 + $0x1e8] sm:$0xff] }
 0x1cc   :  { %1104 = vmatpush2.msra.mxu1 %v582_v34  ;;  %1175 = vmatpush2.msra.mxu0 %v806_v35  ;;  %v711_v34 = vld [vmem:[%s3462_s5 + $0x8e8] sm:$0xff]  ;;  %v486_v35 = vld [vmem:[%s3462_s5 + $0x1e0] sm:$0xff] }
 0x1cd   :  { %1105 = vmatprep.subr.mxu1 %v576_v36  ;;  %1176 = vmatprep.subr.mxu0 %v800_v37  ;;  %v710_v36 = vld [vmem:[%s3462_s5 + $0x8e0] sm:$0xff]  ;;  %v480_v37 = vld [vmem:[%s3462_s5 + $0x1b0] sm:$0xff] }
 0x1ce   :  { %1106 = vmatpush2.msra.mxu1 %v575_v38  ;;  %1177 = vmatpush2.msra.mxu0 %v799_v39  ;;  %v704_v38 = vld [vmem:[%s3462_s5 + $0x8b0] sm:$0xff]  ;;  %v479_v39 = vld [vmem:[%s3462_s5 + $0x1a8] sm:$0xff] }
 0x1cf   :  { %1107 = vmatprep.subr.mxu1 %v569_v40  ;;  %1178 = vmatprep.subr.mxu0 %v793_v41  ;;  %v703_v40 = vld [vmem:[%s3462_s5 + $0x8a8] sm:$0xff]  ;;  %v473_v41 = vld [vmem:[%s3462_s5 + $0x178] sm:$0xff] }
 0x1d0   :  { %1108 = vmatpush2.msra.mxu1 %v568_v42  ;;  %1179 = vmatpush2.msra.mxu0 %v792_v43  ;;  %v697_v42 = vld [vmem:[%s3462_s5 + $0x878] sm:$0xff]  ;;  %v472_v43 = vld [vmem:[%s3462_s5 + $0x170] sm:$0xff] }
 0x1d1   :  { %1109 = vmatprep.subr.mxu1 %v562_v48  ;;  %1180 = vmatprep.subr.mxu0 %v786_v49  ;;  %v696_v48 = vld [vmem:[%s3462_s5 + $0x870] sm:$0xff]  ;;  %v466_v49 = vld [vmem:[%s3462_s5 + $0x140] sm:$0xff] }
 0x1d2   :  { %1110 = vmatpush2.msra.mxu1 %v561_v50  ;;  %1181 = vmatpush2.msra.mxu0 %v785_v51  ;;  %v690_v50 = vld [vmem:[%s3462_s5 + $0x840] sm:$0xff]  ;;  %v465_v51 = vld [vmem:[%s3462_s5 + $0x138] sm:$0xff] }
 0x1d3   :  { %1111 = vmatprep.subr.mxu1 %v555_v52  ;;  %1182 = vmatprep.subr.mxu0 %v779_v53  ;;  %v689_v52 = vld [vmem:[%s3462_s5 + $0x838] sm:$0xff]  ;;  %v459_v53 = vld [vmem:[%s3462_s5 + $0x108] sm:$0xff] }
 0x1d4   :  { %1112 = vmatpush2.msra.mxu1 %v554_v54  ;;  %1183 = vmatpush2.msra.mxu0 %v778_v55  ;;  %v683_v54 = vld [vmem:[%s3462_s5 + $0x808] sm:$0xff]  ;;  %v458_v55 = vld [vmem:[%s3462_s5 + $0x100] sm:$0xff] }
 0x1d5   :  { %1113 = vmatprep.subr.mxu1 %v548_v56  ;;  %1184 = vmatprep.subr.mxu0 %v772_v57  ;;  %v682_v56 = vld [vmem:[%s3462_s5 + $0x800] sm:$0xff]  ;;  %v452_v57 = vld [vmem:[%s3462_s5 + $0xd0] sm:$0xff] }
 0x1d6   :  { %1114 = vmatpush2.msra.mxu1 %v547_v58  ;;  %1185 = vmatpush2.msra.mxu0 %v771_v59  ;;  %v676_v58 = vld [vmem:[%s3462_s5 + $0x7d0] sm:$0xff]  ;;  %v451_v59 = vld [vmem:[%s3462_s5 + $0xc8] sm:$0xff] }
 0x1d7   :  { %1115 = vmatprep.subr.mxu1 %v541_v60  ;;  %1186 = vmatprep.subr.mxu0 %v765_v61  ;;  %v675_v60 = vld [vmem:[%s3462_s5 + $0x7c8] sm:$0xff]  ;;  %v445_v61 = vld [vmem:[%s3462_s5 + $0x98] sm:$0xff] }
 0x1d8   :  { %1116 = vmatpush2.msra.mxu1 %v540_v62  ;;  %1187 = vmatpush2.msra.mxu0 %v764_v63  ;;  %v669_v62 = vld [vmem:[%s3462_s5 + $0x798] sm:$0xff]  ;;  %v444_v63 = vld [vmem:[%s3462_s5 + $0x90] sm:$0xff] }
 0x1d9   :  { %1118 = vmatmul.mubr.f32.vlgmr.msra.gmra.mxu1 %v2468_v46  ;;  %1189 = vmatmul.mubr.f32.vlgmr.msra.gmra.mxu0 %v2470_v47 }
 0x1da   :  { %1195 = vmatprep.subr.mxu1 %v536_v0  ;;  %1266 = vmatprep.subr.mxu0 %v760_v1  ;;  %v668_v0 = vld [vmem:[%s3462_s5 + $0x790] sm:$0xff]  ;;  %v438_v1 = vld [vmem:[%s3462_s5 + $0x60] sm:$0xff] }
 0x1db   :  { %1196 = vmatpush1.msra.mxu1 %v535_v2  ;;  %1259 = vmatprep.mubr.f32.mxu1 %v2464_v44  ;;  %v662_v2 = vld [vmem:[%s3462_s5 + $0x760] sm:$0xff] }
 0x1dc   :  { %1267 = vmatpush1.msra.mxu0 %v759_v3  ;;  %1330 = vmatprep.mubr.f32.mxu0 %v2466_v45  ;;  %v437_v3 = vld [vmem:[%s3462_s5 + $0x58] sm:$0xff] }
 0x1dd   :  { %1197 = vmatprep.subr.mxu1 %v529_v4  ;;  %1268 = vmatprep.subr.mxu0 %v753_v5  ;;  %v661_v4 = vld [vmem:[%s3462_s5 + $0x758] sm:$0xff]  ;;  %v431_v5 = vld [vmem:[%s3462_s5 + $0x28] sm:$0xff] }
 0x1de   :  { %1198 = vmatpush1.msra.mxu1 %v528_v6  ;;  %1269 = vmatpush1.msra.mxu0 %v752_v7  ;;  %v655_v6 = vld [vmem:[%s3462_s5 + $0x728] sm:$0xff]  ;;  %v430_v7 = vld [vmem:[%s3462_s5 + $0x20] sm:$0xff] }
 0x1df   :  { %1199 = vmatprep.subr.mxu1 %v522_v8  ;;  %1270 = vmatprep.subr.mxu0 %v746_v9  ;;  %v654_v8 = vld [vmem:[%s3462_s5 + $0x720] sm:$0xff]  ;;  %v648_v9 = vld [vmem:[%s3462_s5 + $0x6f0] sm:$0xff] }
 0x1e0   :  { %1200 = vmatpush1.msra.mxu1 %v521_v10  ;;  %1271 = vmatpush1.msra.mxu0 %v745_v13  ;;  %v872_v10 = vld [vmem:[%s3462_s5 + $0xdf0] sm:$0xff]  ;;  %v647_v13 = vld [vmem:[%s3462_s5 + $0x6e8] sm:$0xff] }
 0x1e1   :  { %1201 = vmatprep.subr.mxu1 %v515_v15  ;;  %1272 = vmatprep.subr.mxu0 %v739_v16  ;;  %v871_v15 = vld [vmem:[%s3462_s5 + $0xde8] sm:$0xff]  ;;  %v641_v16 = vld [vmem:[%s3462_s5 + $0x6b8] sm:$0xff] }
 0x1e2   :  { %1202 = vmatpush1.msra.mxu1 %v514_v17  ;;  %1273 = vmatpush1.msra.mxu0 %v738_v18  ;;  %v865_v17 = vld [vmem:[%s3462_s5 + $0xdb8] sm:$0xff]  ;;  %v640_v18 = vld [vmem:[%s3462_s5 + $0x6b0] sm:$0xff] }
 0x1e3   :  { %1203 = vmatprep.subr.mxu1 %v508_v19  ;;  %1274 = vmatprep.subr.mxu0 %v732_v20  ;;  %v864_v19 = vld [vmem:[%s3462_s5 + $0xdb0] sm:$0xff]  ;;  %v634_v20 = vld [vmem:[%s3462_s5 + $0x680] sm:$0xff] }
 0x1e4   :  { %1204 = vmatpush1.msra.mxu1 %v507_v21  ;;  %1275 = vmatpush1.msra.mxu0 %v731_v22  ;;  %v858_v21 = vld [vmem:[%s3462_s5 + $0xd80] sm:$0xff]  ;;  %v633_v22 = vld [vmem:[%s3462_s5 + $0x678] sm:$0xff] }
 0x1e5   :  { %1205 = vmatprep.subr.mxu1 %v501_v23  ;;  %1276 = vmatprep.subr.mxu0 %v725_v24  ;;  %v857_v23 = vld [vmem:[%s3462_s5 + $0xd78] sm:$0xff]  ;;  %v627_v24 = vld [vmem:[%s3462_s5 + $0x648] sm:$0xff] }
 0x1e6   :  { %1206 = vmatpush1.msra.mxu1 %v500_v25  ;;  %1277 = vmatpush1.msra.mxu0 %v724_v26  ;;  %v851_v25 = vld [vmem:[%s3462_s5 + $0xd48] sm:$0xff]  ;;  %v626_v26 = vld [vmem:[%s3462_s5 + $0x640] sm:$0xff] }
 0x1e7   :  { %1207 = vmatprep.subr.mxu1 %v494_v27  ;;  %1278 = vmatprep.subr.mxu0 %v718_v28  ;;  %v850_v27 = vld [vmem:[%s3462_s5 + $0xd40] sm:$0xff]  ;;  %v620_v28 = vld [vmem:[%s3462_s5 + $0x610] sm:$0xff] }
 0x1e8   :  { %1208 = vmatpush1.msra.mxu1 %v493_v30  ;;  %1279 = vmatpush1.msra.mxu0 %v717_v32  ;;  %v844_v30 = vld [vmem:[%s3462_s5 + $0xd10] sm:$0xff]  ;;  %v619_v32 = vld [vmem:[%s3462_s5 + $0x608] sm:$0xff] }
 0x1e9   :  { %1209 = vmatprep.subr.mxu1 %v487_v33  ;;  %1280 = vmatprep.subr.mxu0 %v711_v34  ;;  %v843_v33 = vld [vmem:[%s3462_s5 + $0xd08] sm:$0xff]  ;;  %v613_v34 = vld [vmem:[%s3462_s5 + $0x5d8] sm:$0xff] }
 0x1ea   :  { %1210 = vmatpush1.msra.mxu1 %v486_v35  ;;  %1281 = vmatpush1.msra.mxu0 %v710_v36  ;;  %v837_v35 = vld [vmem:[%s3462_s5 + $0xcd8] sm:$0xff]  ;;  %v612_v36 = vld [vmem:[%s3462_s5 + $0x5d0] sm:$0xff] }
 0x1eb   :  { %1211 = vmatprep.subr.mxu1 %v480_v37  ;;  %1282 = vmatprep.subr.mxu0 %v704_v38  ;;  %v836_v37 = vld [vmem:[%s3462_s5 + $0xcd0] sm:$0xff]  ;;  %v606_v38 = vld [vmem:[%s3462_s5 + $0x5a0] sm:$0xff] }
 0x1ec   :  { %1212 = vmatpush1.msra.mxu1 %v479_v39  ;;  %1283 = vmatpush1.msra.mxu0 %v703_v40  ;;  %v830_v39 = vld [vmem:[%s3462_s5 + $0xca0] sm:$0xff]  ;;  %v605_v40 = vld [vmem:[%s3462_s5 + $0x598] sm:$0xff] }
 0x1ed   :  { %1213 = vmatprep.subr.mxu1 %v473_v41  ;;  %1284 = vmatprep.subr.mxu0 %v697_v42  ;;  %v829_v41 = vld [vmem:[%s3462_s5 + $0xc98] sm:$0xff]  ;;  %v599_v42 = vld [vmem:[%s3462_s5 + $0x568] sm:$0xff] }
 0x1ee   :  { %1214 = vmatpush1.msra.mxu1 %v472_v43  ;;  %1285 = vmatpush1.msra.mxu0 %v696_v48  ;;  %v823_v43 = vld [vmem:[%s3462_s5 + $0xc68] sm:$0xff]  ;;  %v598_v48 = vld [vmem:[%s3462_s5 + $0x560] sm:$0xff] }
 0x1ef   :  { %1215 = vmatprep.subr.mxu1 %v466_v49  ;;  %1286 = vmatprep.subr.mxu0 %v690_v50  ;;  %v822_v49 = vld [vmem:[%s3462_s5 + $0xc60] sm:$0xff]  ;;  %v592_v50 = vld [vmem:[%s3462_s5 + $0x530] sm:$0xff] }
 0x1f0   :  { %1216 = vmatpush1.msra.mxu1 %v465_v51  ;;  %1287 = vmatpush1.msra.mxu0 %v689_v52  ;;  %v816_v51 = vld [vmem:[%s3462_s5 + $0xc30] sm:$0xff]  ;;  %v591_v52 = vld [vmem:[%s3462_s5 + $0x528] sm:$0xff] }
 0x1f1   :  { %1217 = vmatprep.subr.mxu1 %v459_v53  ;;  %1288 = vmatprep.subr.mxu0 %v683_v54  ;;  %v815_v53 = vld [vmem:[%s3462_s5 + $0xc28] sm:$0xff]  ;;  %v585_v54 = vld [vmem:[%s3462_s5 + $0x4f8] sm:$0xff] }
 0x1f2   :  { %1218 = vmatpush1.msra.mxu1 %v458_v55  ;;  %1289 = vmatpush1.msra.mxu0 %v682_v56  ;;  %v809_v55 = vld [vmem:[%s3462_s5 + $0xbf8] sm:$0xff]  ;;  %v584_v56 = vld [vmem:[%s3462_s5 + $0x4f0] sm:$0xff] }
 0x1f3   :  { %1219 = vmatprep.subr.mxu1 %v452_v57  ;;  %1290 = vmatprep.subr.mxu0 %v676_v58  ;;  %v808_v57 = vld [vmem:[%s3462_s5 + $0xbf0] sm:$0xff]  ;;  %v578_v58 = vld [vmem:[%s3462_s5 + $0x4c0] sm:$0xff] }
 0x1f4   :  { %1220 = vmatpush1.msra.mxu1 %v451_v59  ;;  %1291 = vmatpush1.msra.mxu0 %v675_v60  ;;  %v802_v59 = vld [vmem:[%s3462_s5 + $0xbc0] sm:$0xff]  ;;  %v577_v60 = vld [vmem:[%s3462_s5 + $0x4b8] sm:$0xff] }
 0x1f5   :  { %1221 = vmatprep.subr.mxu1 %v445_v61  ;;  %1292 = vmatprep.subr.mxu0 %v669_v62  ;;  %v801_v61 = vld [vmem:[%s3462_s5 + $0xbb8] sm:$0xff]  ;;  %v571_v62 = vld [vmem:[%s3462_s5 + $0x488] sm:$0xff] }
 0x1f6   :  { %1222 = vmatpush1.msra.mxu1 %v444_v63  ;;  %1293 = vmatpush1.msra.mxu0 %v668_v0  ;;  %v795_v63 = vld [vmem:[%s3462_s5 + $0xb88] sm:$0xff]  ;;  %v570_v0 = vld [vmem:[%s3462_s5 + $0x480] sm:$0xff] }
 0x1f7   :  { %1223 = vmatprep.subr.mxu1 %v438_v1  ;;  %1294 = vmatprep.subr.mxu0 %v662_v2  ;;  %v794_v1 = vld [vmem:[%s3462_s5 + $0xb80] sm:$0xff]  ;;  %v564_v2 = vld [vmem:[%s3462_s5 + $0x450] sm:$0xff] }
 0x1f8   :  { %1224 = vmatpush1.msra.mxu1 %v437_v3  ;;  %1295 = vmatpush1.msra.mxu0 %v661_v4  ;;  %v788_v3 = vld [vmem:[%s3462_s5 + $0xb50] sm:$0xff]  ;;  %v563_v4 = vld [vmem:[%s3462_s5 + $0x448] sm:$0xff] }
 0x1f9   :  { %1225 = vmatprep.subr.mxu1 %v431_v5  ;;  %1296 = vmatprep.subr.mxu0 %v655_v6  ;;  %v787_v5 = vld [vmem:[%s3462_s5 + $0xb48] sm:$0xff]  ;;  %v557_v6 = vld [vmem:[%s3462_s5 + $0x418] sm:$0xff] }
 0x1fa   :  { %1226 = vmatpush1.msra.mxu1 %v430_v7  ;;  %1297 = vmatpush1.msra.mxu0 %v654_v8  ;;  %v781_v7 = vld [vmem:[%s3462_s5 + $0xb18] sm:$0xff]  ;;  %v556_v8 = vld [vmem:[%s3462_s5 + $0x410] sm:$0xff] }
 0x1fb   :  { %1227 = vmatprep.subr.mxu1 %v648_v9  ;;  %1298 = vmatprep.subr.mxu0 %v872_v10  ;;  %v780_v9 = vld [vmem:[%s3462_s5 + $0xb10] sm:$0xff]  ;;  %v550_v10 = vld [vmem:[%s3462_s5 + $0x3e0] sm:$0xff] }
 0x1fc   :  { %1228 = vmatpush2.msra.mxu1 %v647_v13  ;;  %1299 = vmatpush2.msra.mxu0 %v871_v15  ;;  %v774_v13 = vld [vmem:[%s3462_s5 + $0xae0] sm:$0xff]  ;;  %v549_v15 = vld [vmem:[%s3462_s5 + $0x3d8] sm:$0xff] }
 0x1fd   :  { %1229 = vmatprep.subr.mxu1 %v641_v16  ;;  %1300 = vmatprep.subr.mxu0 %v865_v17  ;;  %v773_v16 = vld [vmem:[%s3462_s5 + $0xad8] sm:$0xff]  ;;  %v543_v17 = vld [vmem:[%s3462_s5 + $0x3a8] sm:$0xff] }
 0x1fe   :  { %1230 = vmatpush2.msra.mxu1 %v640_v18  ;;  %1301 = vmatpush2.msra.mxu0 %v864_v19  ;;  %v767_v18 = vld [vmem:[%s3462_s5 + $0xaa8] sm:$0xff]  ;;  %v542_v19 = vld [vmem:[%s3462_s5 + $0x3a0] sm:$0xff] }
 0x1ff   :  { %1231 = vmatprep.subr.mxu1 %v634_v20  ;;  %1302 = vmatprep.subr.mxu0 %v858_v21  ;;  %v766_v20 = vld [vmem:[%s3462_s5 + $0xaa0] sm:$0xff]  ;;  %v649_v21 = vld [vmem:[%s3462_s5 + $0x6f8] sm:$0xff] }
 0x200   :  { %1232 = vmatpush2.msra.mxu1 %v633_v22  ;;  %1303 = vmatpush2.msra.mxu0 %v857_v23  ;;  %v873_v22 = vld [vmem:[%s3462_s5 + $0xdf8] sm:$0xff] }
 0x201   :  { %1233 = vmatprep.subr.mxu1 %v627_v24  ;;  %1304 = vmatprep.subr.mxu0 %v851_v25  ;;  %v537_v23 = vld [vmem:[%s3462_s5 + $0x378] sm:$0xff]  ;;  %v642_v25 = vld [vmem:[%s3462_s5 + $0x6c0] sm:$0xff] }
 0x202   :  { %1234 = vmatpush2.msra.mxu1 %v626_v26  ;;  %1305 = vmatpush2.msra.mxu0 %v850_v27  ;;  %v761_v24 = vld [vmem:[%s3462_s5 + $0xa78] sm:$0xff]  ;;  %v866_v26 = vld [vmem:[%s3462_s5 + $0xdc0] sm:$0xff] }
 0x203   :  { %1235 = vmatprep.subr.mxu1 %v620_v28  ;;  %1306 = vmatprep.subr.mxu0 %v844_v30  ;;  %v530_v27 = vld [vmem:[%s3462_s5 + $0x340] sm:$0xff]  ;;  %v635_v30 = vld [vmem:[%s3462_s5 + $0x688] sm:$0xff] }
 0x204   :  { %1236 = vmatpush2.msra.mxu1 %v619_v32  ;;  %1307 = vmatpush2.msra.mxu0 %v843_v33  ;;  %v754_v28 = vld [vmem:[%s3462_s5 + $0xa40] sm:$0xff]  ;;  %v859_v32 = vld [vmem:[%s3462_s5 + $0xd88] sm:$0xff] }
 0x205   :  { %1237 = vmatprep.subr.mxu1 %v613_v34  ;;  %1308 = vmatprep.subr.mxu0 %v837_v35  ;;  %v747_v33 = vld [vmem:[%s3462_s5 + $0xa08] sm:$0xff]  ;;  %v852_v34 = vld [vmem:[%s3462_s5 + $0xd50] sm:$0xff] }
 0x206   :  { %1238 = vmatpush2.msra.mxu1 %v612_v36  ;;  %1309 = vmatpush2.msra.mxu0 %v836_v37  ;;  %v516_v35 = vld [vmem:[%s3462_s5 + $0x2d0] sm:$0xff]  ;;  %v621_v37 = vld [vmem:[%s3462_s5 + $0x618] sm:$0xff] }
 0x207   :  { %1239 = vmatprep.subr.mxu1 %v606_v38  ;;  %1310 = vmatprep.subr.mxu0 %v830_v39  ;;  %v740_v36 = vld [vmem:[%s3462_s5 + $0x9d0] sm:$0xff]  ;;  %v845_v38 = vld [vmem:[%s3462_s5 + $0xd18] sm:$0xff] }
 0x208   :  { %1240 = vmatpush2.msra.mxu1 %v605_v40  ;;  %1311 = vmatpush2.msra.mxu0 %v829_v41  ;;  %v509_v39 = vld [vmem:[%s3462_s5 + $0x298] sm:$0xff]  ;;  %v614_v41 = vld [vmem:[%s3462_s5 + $0x5e0] sm:$0xff] }
 0x209   :  { %1241 = vmatprep.subr.mxu1 %v599_v42  ;;  %1312 = vmatprep.subr.mxu0 %v823_v43  ;;  %v733_v40 = vld [vmem:[%s3462_s5 + $0x998] sm:$0xff]  ;;  %v838_v42 = vld [vmem:[%s3462_s5 + $0xce0] sm:$0xff] }
 0x20a   :  { %1242 = vmatpush2.msra.mxu1 %v598_v48  ;;  %1313 = vmatpush2.msra.mxu0 %v822_v49  ;;  %v502_v43 = vld [vmem:[%s3462_s5 + $0x260] sm:$0xff]  ;;  %v607_v49 = vld [vmem:[%s3462_s5 + $0x5a8] sm:$0xff] }
 0x20b   :  { %1243 = vmatprep.subr.mxu1 %v592_v50  ;;  %1314 = vmatprep.subr.mxu0 %v816_v51  ;;  %v726_v48 = vld [vmem:[%s3462_s5 + $0x960] sm:$0xff]  ;;  %v831_v50 = vld [vmem:[%s3462_s5 + $0xca8] sm:$0xff] }
 0x20c   :  { %1244 = vmatpush2.msra.mxu1 %v591_v52  ;;  %1315 = vmatpush2.msra.mxu0 %v815_v53  ;;  %v495_v51 = vld [vmem:[%s3462_s5 + $0x228] sm:$0xff]  ;;  %v600_v53 = vld [vmem:[%s3462_s5 + $0x570] sm:$0xff] }
 0x20d   :  { %1245 = vmatprep.subr.mxu1 %v585_v54  ;;  %1316 = vmatprep.subr.mxu0 %v809_v55  ;;  %v719_v52 = vld [vmem:[%s3462_s5 + $0x928] sm:$0xff]  ;;  %v824_v54 = vld [vmem:[%s3462_s5 + $0xc70] sm:$0xff] }
 0x20e   :  { %1246 = vmatpush2.msra.mxu1 %v584_v56  ;;  %1317 = vmatpush2.msra.mxu0 %v808_v57  ;;  %v488_v55 = vld [vmem:[%s3462_s5 + $0x1f0] sm:$0xff]  ;;  %v593_v57 = vld [vmem:[%s3462_s5 + $0x538] sm:$0xff] }
 0x20f   :  { %1247 = vmatprep.subr.mxu1 %v578_v58  ;;  %1318 = vmatprep.subr.mxu0 %v802_v59  ;;  %v712_v56 = vld [vmem:[%s3462_s5 + $0x8f0] sm:$0xff]  ;;  %v817_v58 = vld [vmem:[%s3462_s5 + $0xc38] sm:$0xff] }
 0x210   :  { %1248 = vmatpush2.msra.mxu1 %v577_v60  ;;  %1319 = vmatpush2.msra.mxu0 %v801_v61  ;;  %v481_v59 = vld [vmem:[%s3462_s5 + $0x1b8] sm:$0xff]  ;;  %v586_v61 = vld [vmem:[%s3462_s5 + $0x500] sm:$0xff] }
 0x211   :  { %1249 = vmatprep.subr.mxu1 %v571_v62  ;;  %1320 = vmatprep.subr.mxu0 %v795_v63  ;;  %v705_v60 = vld [vmem:[%s3462_s5 + $0x8b8] sm:$0xff]  ;;  %v810_v62 = vld [vmem:[%s3462_s5 + $0xc00] sm:$0xff] }
 0x212   :  { %1250 = vmatpush2.msra.mxu1 %v570_v0  ;;  %1321 = vmatpush2.msra.mxu0 %v794_v1  ;;  %v474_v63 = vld [vmem:[%s3462_s5 + $0x180] sm:$0xff]  ;;  %v579_v1 = vld [vmem:[%s3462_s5 + $0x4c8] sm:$0xff] }
 0x213   :  { %1251 = vmatprep.subr.mxu1 %v564_v2  ;;  %1322 = vmatprep.subr.mxu0 %v788_v3  ;;  %v698_v0 = vld [vmem:[%s3462_s5 + $0x880] sm:$0xff]  ;;  %v803_v2 = vld [vmem:[%s3462_s5 + $0xbc8] sm:$0xff] }
 0x214   :  { %1252 = vmatpush2.msra.mxu1 %v563_v4  ;;  %1323 = vmatpush2.msra.mxu0 %v787_v5  ;;  %v467_v3 = vld [vmem:[%s3462_s5 + $0x148] sm:$0xff]  ;;  %v572_v5 = vld [vmem:[%s3462_s5 + $0x490] sm:$0xff] }
 0x215   :  { %1253 = vmatprep.subr.mxu1 %v557_v6  ;;  %1324 = vmatprep.subr.mxu0 %v781_v7  ;;  %v691_v4 = vld [vmem:[%s3462_s5 + $0x848] sm:$0xff]  ;;  %v796_v6 = vld [vmem:[%s3462_s5 + $0xb90] sm:$0xff] }
 0x216   :  { %1254 = vmatpush2.msra.mxu1 %v556_v8  ;;  %1325 = vmatpush2.msra.mxu0 %v780_v9  ;;  %v460_v7 = vld [vmem:[%s3462_s5 + $0x110] sm:$0xff]  ;;  %v565_v9 = vld [vmem:[%s3462_s5 + $0x458] sm:$0xff] }
 0x217   :  { %1255 = vmatprep.subr.mxu1 %v550_v10  ;;  %1326 = vmatprep.subr.mxu0 %v774_v13  ;;  %v684_v8 = vld [vmem:[%s3462_s5 + $0x810] sm:$0xff]  ;;  %v789_v10 = vld [vmem:[%s3462_s5 + $0xb58] sm:$0xff] }
 0x218   :  { %1256 = vmatpush2.msra.mxu1 %v549_v15  ;;  %1327 = vmatpush2.msra.mxu0 %v773_v16  ;;  %v453_v13 = vld [vmem:[%s3462_s5 + $0xd8] sm:$0xff]  ;;  %v558_v16 = vld [vmem:[%s3462_s5 + $0x420] sm:$0xff] }
 0x219   :  { %1257 = vmatprep.subr.mxu1 %v543_v17  ;;  %1328 = vmatprep.subr.mxu0 %v767_v18  ;;  %v677_v15 = vld [vmem:[%s3462_s5 + $0x7d8] sm:$0xff]  ;;  %v782_v17 = vld [vmem:[%s3462_s5 + $0xb20] sm:$0xff] }
 0x21a   :  { %1258 = vmatpush2.msra.mxu1 %v542_v19  ;;  %1329 = vmatpush2.msra.mxu0 %v766_v20  ;;  %v446_v18 = vld [vmem:[%s3462_s5 + $0xa0] sm:$0xff]  ;;  %v551_v20 = vld [vmem:[%s3462_s5 + $0x3e8] sm:$0xff] }
 0x21b   :  { %1260 = vmatmul.mubr.f32.vlgmr.msra.gmra.mxu1 %v2468_v46  ;;  %1331 = vmatmul.mubr.f32.vlgmr.msra.gmra.mxu0 %v2470_v47  ;;  %v670_v19 = vld [vmem:[%s3462_s5 + $0x7a0] sm:$0xff] }
 0x21c   :  { %1509 = vmatprep.subr.mxu1 %v649_v21  ;;  %1544 = vmatprep.subr.mxu0 %v873_v22  ;;  %v775_v21 = vld [vmem:[%s3462_s5 + $0xae8] sm:$0xff] }
 0x21d   :  { %1510 = vmatpush3.msra.mxu1 %v537_v23  ;;  %1401 = vmatprep.mubr.f32.mxu1 %v2464_v44  ;;  %v523_v44 = vld [vmem:[%s3462_s5 + $0x308] sm:$0xff] }
 0x21e   :  { %1545 = vmatpush3.msra.mxu0 %v761_v24  ;;  %1471 = vmatprep.mubr.f32.mxu0 %v2466_v45  ;;  %v628_v45 = vld [vmem:[%s3462_s5 + $0x650] sm:$0xff]  ;;  %v439_v22 = vld [vmem:[%s3462_s5 + $0x68] sm:$0xff] }
 0x21f   :  { %1511 = vmatprep.subr.mxu1 %v642_v25  ;;  %1546 = vmatprep.subr.mxu0 %v866_v26  ;;  %v663_v23 = vld [vmem:[%s3462_s5 + $0x768] sm:$0xff]  ;;  %v544_v24 = vld [vmem:[%s3462_s5 + $0x3b0] sm:$0xff] }
 0x220   :  { %1512 = vmatpush3.msra.mxu1 %v530_v27  ;;  %1547 = vmatpush3.msra.mxu0 %v754_v28  ;;  %v768_v25 = vld [vmem:[%s3462_s5 + $0xab0] sm:$0xff]  ;;  %v874_v28 = vld [vmem:[%s3463_s6] sm:$0x7f] }
 0x221   :  { %1513 = vmatprep.subr.mxu1 %v635_v30  ;;  %1548 = vmatprep.subr.mxu0 %v859_v32  ;;  %v432_v26 = vld [vmem:[%s3462_s5 + $0x30] sm:$0xff]  ;;  %v879_v30 = vrot.slane %v874_v28, %v2059_v12  ;;  %v883_v32 = vrot.slane %v874_v28, %v2065_v14  ;;  %v891_v12 = vrot.slane %v874_v28, %v274_v31 }
 0x222   :  { %1514 = vmatpush3.msra.mxu1 %v523_v44  ;;  %1549 = vmatpush3.msra.mxu0 %v747_v33  ;;  %v656_v27 = vld [vmem:[%s3462_s5 + $0x730] sm:$0xff]  ;;  %s1604_s5 = smov [#allocation2]  }
 0x223   :  { %1515 = vmatprep.subr.mxu1 %v628_v45  ;;  %1550 = vmatprep.subr.mxu0 %v852_v34  ;;  %s1498_s6 = sshll.u32 %s1604_s5, 4  ;;  %s1499_s6 = int_to_ptr.vmem [resolvable:$true] %s1498_s6 }
 0x224   :  { %1516 = vmatpush3.msra.mxu1 %v516_v35  ;;  %1551 = vmatpush3.msra.mxu0 %v740_v36  ;;  %s1581_s9 = scalar_lea.vmem %s1499_s6, 896  ;;  %p1586_p1 = scmp.lt.s32.totalorder %s1499_s6, %s1499_s6 }
 0x225   :  { %1517 = vmatprep.subr.mxu1 %v621_v37  ;;  %1552 = vmatprep.subr.mxu0 %v845_v38  ;;  %p1582_p0 = scmp.ne.s32.totalorder %s1499_s6, %s1581_s9  ;;  %p1587_p2 = scmp.lt.s32.totalorder %s1581_s9, %s1581_s9 }
 0x226   :  { %1518 = vmatpush3.msra.mxu1 %v509_v39  ;;  %1553 = vmatpush3.msra.mxu0 %v733_v40 }
 0x227   :  { %1519 = vmatprep.subr.mxu1 %v614_v41  ;;  %1554 = vmatprep.subr.mxu0 %v838_v42  ;;  %p1588_p3 = por %p1587_p2, %p1586_p1 }
 0x228   :  { %1520 = vmatpush3.msra.mxu1 %v502_v43  ;;  %1555 = vmatpush3.msra.mxu0 %v726_v48 }
 0x229   :  { %1521 = vmatprep.subr.mxu1 %v607_v49  ;;  %1556 = vmatprep.subr.mxu0 %v831_v50  ;;  %p1589_p4 = pnand %p1588_p3, %p1582_p0 }
 0x22a   :  { %1522 = vmatpush3.msra.mxu1 %v495_v51  ;;  %1557 = vmatpush3.msra.mxu0 %v719_v52 }
 0x22b   :  { %1523 = vmatprep.subr.mxu1 %v600_v53  ;;  %1558 = vmatprep.subr.mxu0 %v824_v54  ;;  %v894_v53 = vsub.s32 4, %v2056_v11  ;;  %v898_v54 = vsub.s32 5, %v2056_v11 }
 0x22c   :  { %1524 = vmatpush3.msra.mxu1 %v488_v55  ;;  %1559 = vmatpush3.msra.mxu0 %v712_v56 }
 0x22d   :  { %1525 = vmatprep.subr.mxu1 %v593_v57  ;;  %1560 = vmatprep.subr.mxu0 %v817_v58  ;;  %v899_v55 = vrot.slane %v874_v28, %v898_v54 }
 0x22e   :  { %1526 = vmatpush3.msra.mxu1 %v481_v59  ;;  %1561 = vmatpush3.msra.mxu0 %v705_v60 }
 0x22f   :  { %1527 = vmatprep.subr.mxu1 %v586_v61  ;;  %1562 = vmatprep.subr.mxu0 %v810_v62 }
 0x230   :  { %1528 = vmatpush3.msra.mxu1 %v474_v63  ;;  %1563 = vmatpush3.msra.mxu0 %v698_v0 }
 0x231   :  { %1529 = vmatprep.subr.mxu1 %v579_v1  ;;  %1564 = vmatprep.subr.mxu0 %v803_v2  ;;  %v902_v1 = vsub.s32 6, %v2056_v11 }
 0x232   :  { %1530 = vmatpush3.msra.mxu1 %v467_v3  ;;  %1565 = vmatpush3.msra.mxu0 %v691_v4 }
 0x233   :  { %1531 = vmatprep.subr.mxu1 %v572_v5  ;;  %1566 = vmatprep.subr.mxu0 %v796_v6  ;;  %v903_v4 = vrot.slane %v874_v28, %v902_v1 }
 0x234   :  { %1532 = vmatpush3.msra.mxu1 %v460_v7  ;;  %1567 = vmatpush3.msra.mxu0 %v684_v8 }
 0x235   :  { %1533 = vmatprep.subr.mxu1 %v565_v9  ;;  %1568 = vmatprep.subr.mxu0 %v789_v10 }
 0x236   :  { %1534 = vmatpush3.msra.mxu1 %v453_v13  ;;  %1569 = vmatpush3.msra.mxu0 %v677_v15 }
 0x237   :  { %1535 = vmatprep.subr.mxu1 %v558_v16  ;;  %1570 = vmatprep.subr.mxu0 %v782_v17 }
 0x238   :  { %1536 = vmatpush3.msra.mxu1 %v446_v18  ;;  %1571 = vmatpush3.msra.mxu0 %v670_v19 }
 0x239   :  { %1537 = vmatprep.subr.mxu1 %v551_v20  ;;  %1572 = vmatprep.subr.mxu0 %v775_v21 }
 0x23a   :  { %1538 = vmatpush3.msra.mxu1 %v439_v22  ;;  %1573 = vmatpush3.msra.mxu0 %v663_v23 }
 0x23b   :  { %1539 = vmatprep.subr.mxu1 %v544_v24  ;;  %1574 = vmatprep.subr.mxu0 %v768_v25 }
 0x23c   :  { %1540 = vmatpush3.msra.mxu1 %v432_v26  ;;  %1575 = vmatpush3.msra.mxu0 %v656_v27 }
 0x23d   :  { %1402 = vmatmul.mubr.f32.vlgmr.msra.gmra.mxu1 %v2468_v46  ;;  %1472 = vmatmul.mubr.f32.vlgmr.msra.gmra.mxu0 %v2470_v47  ;;  %v887_v47 = vrot.slane %v874_v28, %v270_v29  ;;  %v895_v29 = vrot.slane %v874_v28, %v894_v53 }
 0x258   :  { %v977_v44 = vpop.f32.mrf.mxu1  ;;  %v1048_v33 = vpop.f32.mrf.mxu0 }
 0x259   :  { %v978_v45 = vadd.f32 %v977_v44, %v879_v30 }
 0x25a   :  { %v979_v34 = vpop.f32.mrf.mxu1  ;;  %v1050_v37 = vpop.f32.mrf.mxu0 }
 0x25b   :  { %v1049_v35 = vadd.f32 %v1048_v33, %v978_v45  ;;  %v980_v36 = vadd.f32 %v979_v34, %v883_v32 }
 0x25d   :  { %v1477_v38 = vmax.f32 %v1049_v35, 0.0  ;;  %v1051_v39 = vadd.f32 %v1050_v37, %v980_v36 }
 0x25f   :  { %1484 = vst [vmem:[#allocation2] sm:$0xff] %v1477_v38  ;;  %v1478_v46 = vmax.f32 %v1051_v39, 0.0 }
 0x261   :  { %1485 = vst [vmem:[#allocation2 + $0x8] sm:$0xff] %v1478_v46 }
 0x299   :  { %v1119_v40 = vpop.f32.mrf.mxu1  ;;  %v1190_v14 = vpop.f32.mrf.mxu0 }
 0x29a   :  { %v1120_v41 = vadd.f32 %v1119_v40, %v887_v47 }
 0x29b   :  { %v1121_v42 = vpop.f32.mrf.mxu1  ;;  %v1192_v49 = vpop.f32.mrf.mxu0 }
 0x29c   :  { %v1191_v43 = vadd.f32 %v1190_v14, %v1120_v41  ;;  %v1122_v48 = vadd.f32 %v1121_v42, %v891_v12 }
 0x29e   :  { %v1479_v50 = vmax.f32 %v1191_v43, 0.0  ;;  %v1193_v51 = vadd.f32 %v1192_v49, %v1122_v48 }
 0x2a0   :  { %1486 = vst [vmem:[#allocation2 + $0x10] sm:$0xff] %v1479_v50  ;;  %v1480_v52 = vmax.f32 %v1193_v51, 0.0 }
 0x2a2   :  { %1487 = vst [vmem:[#allocation2 + $0x18] sm:$0xff] %v1480_v52 }
 0x2db   :  { %v1261_v56 = vpop.f32.mrf.mxu1  ;;  %v1332_v31 = vpop.f32.mrf.mxu0 }
 0x2dc   :  { %v1262_v57 = vadd.f32 %v1261_v56, %v895_v29 }
 0x2dd   :  { %v1263_v58 = vpop.f32.mrf.mxu1  ;;  %v1334_v61 = vpop.f32.mrf.mxu0 }
 0x2de   :  { %v1333_v59 = vadd.f32 %v1332_v31, %v1262_v57  ;;  %v1264_v60 = vadd.f32 %v1263_v58, %v899_v55 }
 0x2e0   :  { %v1481_v62 = vmax.f32 %v1333_v59, 0.0  ;;  %v1335_v63 = vadd.f32 %v1334_v61, %v1264_v60 }
 0x2e2   :  { %1488 = vst [vmem:[#allocation2 + $0x20] sm:$0xff] %v1481_v62  ;;  %v1482_v0 = vmax.f32 %v1335_v63, 0.0 }
 0x2e4   :  { %1489 = vst [vmem:[#allocation2 + $0x28] sm:$0xff] %v1482_v0 }
 0x2fd   :  { %v1541_v2 = vpop.f32.mrf.mxu1  ;;  %v1576_v3 = vpop.f32.mrf.mxu0 }
 0x2ff   :  { %v1542_v5 = vpop.f32.mrf.mxu1  ;;  %v1577_v6 = vpop.f32.mrf.mxu0 }
 0x300   :  { %v1543_v7 = vadd.f32 %v1542_v5, %v1541_v2  ;;  %v1578_v9 = vadd.f32 %v1577_v6, %v1576_v3 }
 0x302   :  { %v1404_v8 = vadd.f32 %v1543_v7, %v903_v4 }
 0x304   :  { %v1474_v10 = vadd.f32 %v1578_v9, %v1404_v8 }
 0x306   :  { %v1483_v13 = vmax.f32 %v1474_v10, 0.0 }
 0x308   :  { %1491 = vst.msk [vmem:[#allocation2 + $0x30] sm:$0xff] %vm1490_vm2, %v1483_v13 }
 0x309   :  { %1592 = shalt.err (!%p1589_p4)
}
 0x30a   :  { %1501 = dma.vmem_to_hbm [thread:$0]  %s1499_s6, 896, %s3464_s7, [#allocation3]  }
 0x30b   :  { %1601 = dma.done.wait [#allocation3], 896  }
 0x30c   :  { %1602 = vsyncadd [#allocation3], 4294966400 }
 0x30d   :  { %1505 = vsyncpa [#allocation3], 1 }

</bundles_post_ra>
